<compile_context>
chip_gen: v7x
topology: tpu7x:2x2x1
jax: 0.10.0
libtpu: 0.0.40
codegen_flags: <defaults>
</compile_context>

<pallas_src>
from functools import partial

import jax
import jax.numpy as jnp
from jax.experimental import pallas as pl
from jax.experimental.pallas import tpu as pltpu


# ----------------------------- in-kernel math ------------------------------

def _layernorm(x, gamma, beta, eps=1e-5):
    # PyTorch nn.LayerNorm over the last dim: biased variance, eps inside sqrt.
    mu = jnp.mean(x, axis=-1, keepdims=True)
    xc = x - mu
    var = jnp.mean(xc * xc, axis=-1, keepdims=True)
    return xc * jax.lax.rsqrt(var + eps) * gamma + beta


def _erf(x):
    # Abramowitz & Stegun 7.1.26 (max abs err 1.5e-7): only mul/add/div/exp/
    # abs/where, all of which lower on every TPU generation.
    a1, a2, a3, a4, a5 = 0.254829592, -0.284496736, 1.421413741, -1.453152027, 1.061405429
    p = 0.3275911
    z = jnp.abs(x)
    t = 1.0 / (1.0 + p * z)
    poly = ((((a5 * t + a4) * t + a3) * t + a2) * t + a1) * t
    e = 1.0 - poly * jnp.exp(-z * z)
    return jnp.where(x >= 0, e, -e)


def _gelu_exact(x):
    # PyTorch nn.GELU() default (erf form).
    return 0.5 * x * (1.0 + _erf(x * 0.7071067811865476))


def _gelu_tanh(x):
    # tanh approximation -> EUP slot (optional, gated behind approx_gelu).
    return jax.nn.gelu(x, approximate=True)


# -------------------------------- kernel -----------------------------------

def mixer_kernel(x_ref, cwT_ref, cb_ref,
                 tw1_ref, tb1_ref, tw2_ref, tb2_ref,
                 chw1_ref, chb1_ref, chw2_ref, chb2_ref,
                 tng_ref, tnb_ref, cng_ref, cnb_ref,
                 o_ref, *, num_layers, approx_gelu):
    Bb, N, C = x_ref.shape                    # block: (batch_block, tokens, channels)
    mm_dtype = cwT_ref.dtype                  # f32 or bf16 (weights pre-cast in wrapper)
    gelu = _gelu_tanh if approx_gelu else _gelu_exact

    def mm(a, b):
        # MXU matmul; operands in mm_dtype, accumulation always f32.
        return jnp.dot(a.astype(mm_dtype), b.astype(mm_dtype),
                       preferred_element_type=jnp.float32)

    # Stacked activation: rows = Bb*N tokens (sublanes), lanes = C channels.
    # N % 8 == 0 (asserted in the wrapper) keeps this reshape a free relabel.
    x = x_ref[...].reshape(Bb * N, C)

    # channel_linear (1x1 Conv1d) as one right matmul with pre-transposed W.
    y = mm(x, cwT_ref[...]) + cb_ref[...]     # (Bb*N, C), f32

    tng, tnb = tng_ref[...], tnb_ref[...]     # (1, C)

    for i in range(num_layers):               # L is small -> static unroll
        # ---- token mixing: stacked right matmuls over the channel (lane) dim
        id1 = y
        t = _layernorm(y, tng, tnb)
        h = gelu(mm(t, tw1_ref[i]) + tb1_ref[i])          # (Bb*N, H)
        t = mm(h, tw2_ref[i]) + tb2_ref[i] + id1          # (Bb*N, C) + residual
        t = _layernorm(t, tng, tnb)

        # ---- channel mixing: per-batch LEFT 2D matmuls with native (out,in)
        #      weights.  No broadcast_to weight replicas, no activation
        #      transposes; biases are lane-dense (H,C)/(N,C).
        w1, b1 = chw1_ref[i], chb1_ref[i]                 # (H, N), (H, C)
        w2, b2 = chw2_ref[i], chb2_ref[i]                 # (N, H), (N, C)
        parts = []
        for b in range(Bb):
            tb = t[b * N:(b + 1) * N, :]                  # (N, C) sublane-aligned slice
            h2 = gelu(mm(w1, tb) + b1)                    # (H, C)
            parts.append(mm(w2, h2) + b2 + tb)            # (N, C) incl. residual
        y = jnp.concatenate(parts, axis=0) if Bb > 1 else parts[0]

    # ---- final channel_norm (LayerNorm over the token axis) + mean over tokens
    cng, cnb = cng_ref[...], cnb_ref[...]                 # (N, C) lane-dense
    outs = []
    for b in range(Bb):
        tb = y[b * N:(b + 1) * N, :]                      # (N, C)
        mu = jnp.mean(tb, axis=0, keepdims=True)          # (1, C)
        xc = tb - mu
        var = jnp.mean(xc * xc, axis=0, keepdims=True)
        z = xc * jax.lax.rsqrt(var + 1e-5) * cng + cnb
        outs.append(jnp.mean(z, axis=0, keepdims=True))   # (1, C)
    o_ref[0] = jnp.concatenate(outs, axis=0) if Bb > 1 else outs[0]   # (Bb, C)


# ------------------------------- wrapper ------------------------------------

def _padded_bytes(shape, dtype):
    """(8,128)-tile-padded single-buffer VMEM footprint estimate."""
    item = jnp.dtype(dtype).itemsize
    s = (1, 1) + tuple(int(d) for d in shape)
    lane = -(-s[-1] // 128) * 128
    sub_tile = 8 * max(1, 4 // item)          # sub-32-bit dtypes pack sublanes
    sub = -(-s[-2] // sub_tile) * sub_tile
    lead = 1
    for d in s[:-2]:
        lead *= d
    return lead * sub * lane * item


def mlp_mixer_1d(x, params, num_layers, *, batch_block=None,
                 matmul_dtype=jnp.float32, approx_gelu=False):
    """x: (B, token_dims, num_tokens) NCL as in the PyTorch module.
    Returns (B, token_dims)."""
    B, C, N = x.shape
    L = num_layers
    H = params["tw1"].shape[-1]
    f32 = jnp.float32
    assert N % 8 == 0, "num_tokens must be a multiple of 8 so in-kernel reshapes/slices stay free"

    if batch_block is None:
        # Split the batch over the grid (two v7x TensorCores) only when each
        # half still feeds the MXU >= 256 rows; otherwise a single grid step
        # (optimal on single-TC v5e/v6e and at small shapes).
        if B % 2 == 0 and (B // 2) * N >= 256:
            batch_block = B // 2
        else:
            batch_block = B
    assert B % batch_block == 0
    G = B // batch_block

    # ---- wrapper-side layout plumbing (XLA, outside the kernel) ----
    x_t = jnp.transpose(x, (0, 2, 1))                     # one-time (B,C,N)->(B,N,C)
    wcast = lambda a: a.astype(matmul_dtype)              # bf16 weights: half DMA/VMEM

    operands = (
        x_t,
        wcast(params["cwT"]),                                              # (C, C)  W.T (in,out)
        params["cb"].reshape(1, C).astype(f32),                            # (1, C)
        wcast(params["tw1"]),                                              # (L, C, H)
        params["tb1"].reshape(L, 1, H).astype(f32),                        # (L, 1, H)
        wcast(params["tw2"]),                                              # (L, H, C)
        params["tb2"].reshape(L, 1, C).astype(f32),                        # (L, 1, C)
        wcast(params["chw1"]),                                             # (L, H, N) native (out,in)
        jnp.broadcast_to(params["chb1"][:, :, None], (L, H, C)).astype(f32),
        wcast(params["chw2"]),                                             # (L, N, H)
        jnp.broadcast_to(params["chb2"][:, :, None], (L, N, C)).astype(f32),
        params["tng"].reshape(1, C).astype(f32),
        params["tnb"].reshape(1, C).astype(f32),
        jnp.broadcast_to(params["cng"][:, None], (N, C)).astype(f32),
        jnp.broadcast_to(params["cnb"][:, None], (N, C)).astype(f32),
    )

    def const(shape):
        nd = len(shape)
        return pl.BlockSpec(shape, lambda g, _nd=nd: (0,) * _nd)

    in_specs = [pl.BlockSpec((batch_block, N, C), lambda g: (g, 0, 0))]
    in_specs += [const(op.shape) for op in operands[1:]]
    out_spec = pl.BlockSpec((1, batch_block, C), lambda g: (g, 0, 0))

    # ---- explicit VMEM budget (v5e default scoped limit is 16 MiB; v7x has
    #      only 64 MiB/TC physical) ----
    io_bytes = sum(2 * _padded_bytes(op.shape, op.dtype) for op in operands)   # double-buffered
    io_bytes += 2 * _padded_bytes((1, batch_block, C), f32)
    act_bytes = 16 * _padded_bytes((batch_block * N, max(C, H)), f32)          # live f32 temporaries
    vmem_limit = int(min(max(32 * 2**20, 2 * (io_bytes + act_bytes)), 64 * 2**20))

    flops = 2 * B * N * C * C + 8 * L * B * N * C * H
    transcendentals = L * B * H * (N + C) + 2 * L * B * N + B * C
    bytes_accessed = int(sum(op.size * op.dtype.itemsize for op in operands) + 4 * B * C)

    out = pl.pallas_call(
        partial(mixer_kernel, num_layers=L, approx_gelu=approx_gelu),
        out_shape=jax.ShapeDtypeStruct((G, batch_block, C), f32),
        grid_spec=pltpu.PrefetchScalarGridSpec(
            num_scalar_prefetch=0,
            grid=(G,),
            in_specs=in_specs,
            out_specs=out_spec,
        ),
        compiler_params=pltpu.CompilerParams(
            dimension_semantics=("parallel",),
            vmem_limit_bytes=vmem_limit,
        ),
        cost_estimate=pl.CostEstimate(
            flops=flops,
            transcendentals=transcendentals,
            bytes_accessed=bytes_accessed),
    )(*operands)
    return out.reshape(B, C)


# --------------------------- pure-JAX reference -----------------------------
# Mirrors the PyTorch module exactly (NCL layout, permutes each layer, shared
# token_norm/channel_norm across layers, exact-erf GELU, all math in f32).

def reference(x, p, num_layers):
    def ln(t, g, b, eps=1e-5):
        mu = t.mean(-1, keepdims=True)
        xc = t - mu
        var = (xc * xc).mean(-1, keepdims=True)
        return xc * jax.lax.rsqrt(var + eps) * g + b

    gelu = lambda v: 0.5 * v * (1.0 + jax.lax.erf(v / jnp.sqrt(2.0)))

    # Conv1d(k=1): weight W (out,in) = cwT.T; bias cb (C,).
    y = jnp.einsum("oi,bin->bon", p["cwT"].T, x) + p["cb"][None, :, None]
    for i in range(num_layers):
        t = jnp.transpose(y, (0, 2, 1))                   # (B, N, C)
        id1 = t
        t = ln(t, p["tng"], p["tnb"])
        t = gelu(t @ p["tw1"][i] + p["tb1"][i]) @ p["tw2"][i] + p["tb2"][i]
        t = t + id1
        t = ln(t, p["tng"], p["tnb"])
        y = jnp.transpose(t, (0, 2, 1))                   # (B, C, N)
        id2 = y
        h = gelu(jnp.einsum("bcn,hn->bch", y, p["chw1"][i]) + p["chb1"][i])
        y = jnp.einsum("bch,nh->bcn", h, p["chw2"][i]) + p["chb2"][i]
        y = y + id2
    y = ln(y, p["cng"], p["cnb"])
    return y.mean(-1)


# --------------------------------- main --------------------------------------

if __name__ == "__main__":
    # batch, token_dims, num_tokens, hidden_dims, num_layers
    B, C, N, H, L = 2, 8, 16, 32, 2

    key = jax.random.PRNGKey(0)
    ks = jax.random.split(key, 15)

    def init(k, shape, fan_in):
        return jax.random.normal(k, shape, jnp.float32) / jnp.sqrt(float(fan_in))

    params = {
        "cwT":  init(ks[0], (C, C), C),      # Conv1d weight, pre-transposed (in, out)
        "cb":   init(ks[1], (C,), C),
        "tw1":  init(ks[2], (L, C, H), C),   # token Linear1, (in, out)
        "tb1":  init(ks[3], (L, H), C),
        "tw2":  init(ks[4], (L, H, C), H),   # token Linear2, (in, out)
        "tb2":  init(ks[5], (L, C), H),
        "chw1": init(ks[6], (L, H, N), N),   # channel Linear1, native (out, in)
        "chb1": init(ks[7], (L, H), N),
        "chw2": init(ks[8], (L, N, H), H),   # channel Linear2, native (out, in)
        "chb2": init(ks[9], (L, N), H),
        "tng": 1.0 + 0.1 * jax.random.normal(ks[10], (C,), jnp.float32),
        "tnb": 0.1 * jax.random.normal(ks[11], (C,), jnp.float32),
        "cng": 1.0 + 0.1 * jax.random.normal(ks[12], (N,), jnp.float32),
        "cnb": 0.1 * jax.random.normal(ks[13], (N,), jnp.float32),
    }
    x = jax.random.normal(ks[14], (B, C, N), jnp.float32)

    ref = jax.block_until_ready(reference(x, params, L))

    # f32 MXU operands: faithful path, tight check.
    out = jax.block_until_ready(mlp_mixer_1d(x, params, L, matmul_dtype=jnp.float32))
    assert out.shape == (B, C), out.shape
    assert jnp.allclose(out, ref, rtol=5e-4, atol=5e-4), (out, ref)

    # bf16 MXU operands (fast path on v6e/v7x): loose smoke check only —
    # semantics are already validated by the f32 run above.
    out_bf16 = jax.block_until_ready(mlp_mixer_1d(x, params, L, matmul_dtype=jnp.bfloat16))
    assert float(jnp.max(jnp.abs(out_bf16 - ref))) < 1e-1, (out_bf16, ref)

    print("KERNEL_OK")
</pallas_src>

<mosaic_0001>
module attributes {stable_mosaic.version = 11 : i64} {
  func.func @mixer_kernel(%arg0: i32, %arg1: memref<2x16x8xf32, #tpu.memory_space<vmem>>, %arg2: memref<8x8xf32, #tpu.memory_space<vmem>>, %arg3: memref<1x8xf32, #tpu.memory_space<vmem>>, %arg4: memref<2x8x32xf32, #tpu.memory_space<vmem>>, %arg5: memref<2x1x32xf32, #tpu.memory_space<vmem>>, %arg6: memref<2x32x8xf32, #tpu.memory_space<vmem>>, %arg7: memref<2x1x8xf32, #tpu.memory_space<vmem>>, %arg8: memref<2x32x16xf32, #tpu.memory_space<vmem>>, %arg9: memref<2x32x8xf32, #tpu.memory_space<vmem>>, %arg10: memref<2x16x32xf32, #tpu.memory_space<vmem>>, %arg11: memref<2x16x8xf32, #tpu.memory_space<vmem>>, %arg12: memref<1x8xf32, #tpu.memory_space<vmem>>, %arg13: memref<1x8xf32, #tpu.memory_space<vmem>>, %arg14: memref<16x8xf32, #tpu.memory_space<vmem>>, %arg15: memref<16x8xf32, #tpu.memory_space<vmem>>, %arg16: memref<1x2x8xf32, #tpu.memory_space<vmem>>) attributes {dimension_semantics = [#tpu.dimension_semantics<parallel>], iteration_bounds = array<i64: 1>, scalar_prefetch = 0 : i64, scratch_operands = 0 : i64, tpu.core_type = #tpu.core_type<tc>, window_params = [{transform_indices = @transform_0, window_bounds = array<i64: 2, 16, 8>}, {pipeline_mode = #tpu.pipeline_mode<synchronous>, transform_indices = @transform_1, window_bounds = array<i64: 8, 8>}, {pipeline_mode = #tpu.pipeline_mode<synchronous>, transform_indices = @transform_2, window_bounds = array<i64: 1, 8>}, {pipeline_mode = #tpu.pipeline_mode<synchronous>, transform_indices = @transform_3, window_bounds = array<i64: 2, 8, 32>}, {pipeline_mode = #tpu.pipeline_mode<synchronous>, transform_indices = @transform_4, window_bounds = array<i64: 2, 1, 32>}, {pipeline_mode = #tpu.pipeline_mode<synchronous>, transform_indices = @transform_5, window_bounds = array<i64: 2, 32, 8>}, {pipeline_mode = #tpu.pipeline_mode<synchronous>, transform_indices = @transform_6, window_bounds = array<i64: 2, 1, 8>}, {pipeline_mode = #tpu.pipeline_mode<synchronous>, transform_indices = @transform_7, window_bounds = array<i64: 2, 32, 16>}, {pipeline_mode = #tpu.pipeline_mode<synchronous>, transform_indices = @transform_8, window_bounds = array<i64: 2, 32, 8>}, {pipeline_mode = #tpu.pipeline_mode<synchronous>, transform_indices = @transform_9, window_bounds = array<i64: 2, 16, 32>}, {pipeline_mode = #tpu.pipeline_mode<synchronous>, transform_indices = @transform_10, window_bounds = array<i64: 2, 16, 8>}, {pipeline_mode = #tpu.pipeline_mode<synchronous>, transform_indices = @transform_11, window_bounds = array<i64: 1, 8>}, {pipeline_mode = #tpu.pipeline_mode<synchronous>, transform_indices = @transform_12, window_bounds = array<i64: 1, 8>}, {pipeline_mode = #tpu.pipeline_mode<synchronous>, transform_indices = @transform_13, window_bounds = array<i64: 16, 8>}, {pipeline_mode = #tpu.pipeline_mode<synchronous>, transform_indices = @transform_14, window_bounds = array<i64: 16, 8>}, {transform_indices = @transform_15, window_bounds = array<i64: 1, 2, 8>}]} {
    %c0 = arith.constant 0 : index
    %c0_0 = arith.constant 0 : index
    %c0_1 = arith.constant 0 : index
    %0 = vector.load %arg1[%c0, %c0_0, %c0_1] : memref<2x16x8xf32, #tpu.memory_space<vmem>>, vector<2x16x8xf32>
    %1 = vector.shape_cast %0 : vector<2x16x8xf32> to vector<32x8xf32>
    %c0_2 = arith.constant 0 : index
    %c0_3 = arith.constant 0 : index
    %2 = vector.load %arg2[%c0_2, %c0_3] : memref<8x8xf32, #tpu.memory_space<vmem>>, vector<8x8xf32>
    %cst = arith.constant dense<0.000000e+00> : vector<32x8xf32>
    %3 = tpu.matmul %1, %2, %cst {dimension_numbers = #tpu.dot_dimension_numbers<[1], [0], [0], [1], [0, 0, 1, 1], [], []>} : vector<32x8xf32>, vector<8x8xf32>, vector<32x8xf32> -> vector<32x8xf32>
    %c0_4 = arith.constant 0 : index
    %c0_5 = arith.constant 0 : index
    %4 = vector.load %arg3[%c0_4, %c0_5] : memref<1x8xf32, #tpu.memory_space<vmem>>, vector<1x8xf32>
    %5 = vector.broadcast %4 : vector<1x8xf32> to vector<32x8xf32>
    %6 = arith.addf %3, %5 : vector<32x8xf32>
    %c0_6 = arith.constant 0 : index
    %c0_7 = arith.constant 0 : index
    %7 = vector.load %arg12[%c0_6, %c0_7] : memref<1x8xf32, #tpu.memory_space<vmem>>, vector<1x8xf32>
    %c0_8 = arith.constant 0 : index
    %c0_9 = arith.constant 0 : index
    %8 = vector.load %arg13[%c0_8, %c0_9] : memref<1x8xf32, #tpu.memory_space<vmem>>, vector<1x8xf32>
    %cst_10 = arith.constant dense<0.000000e+00> : vector<32xf32>
    %9 = vector.multi_reduction <add>, %6, %cst_10 [1] : vector<32x8xf32> to vector<32xf32>
    %10 = vector.shape_cast %9 : vector<32xf32> to vector<32x1xf32>
    %cst_11 = arith.constant 8.000000e+00 : f32
    %11 = vector.broadcast %cst_11 : f32 to vector<32x1xf32>
    %12 = arith.divf %10, %11 : vector<32x1xf32>
    %13 = vector.broadcast %12 : vector<32x1xf32> to vector<32x8xf32>
    %14 = arith.subf %6, %13 : vector<32x8xf32>
    %15 = arith.mulf %14, %14 : vector<32x8xf32>
    %cst_12 = arith.constant dense<0.000000e+00> : vector<32xf32>
    %16 = vector.multi_reduction <add>, %15, %cst_12 [1] : vector<32x8xf32> to vector<32xf32>
    %17 = vector.shape_cast %16 : vector<32xf32> to vector<32x1xf32>
    %cst_13 = arith.constant 8.000000e+00 : f32
    %18 = vector.broadcast %cst_13 : f32 to vector<32x1xf32>
    %19 = arith.divf %17, %18 : vector<32x1xf32>
    %cst_14 = arith.constant 9.99999974E-6 : f32
    %20 = vector.broadcast %cst_14 : f32 to vector<32x1xf32>
    %21 = arith.addf %19, %20 : vector<32x1xf32>
    %22 = math.rsqrt %21 : vector<32x1xf32>
    %23 = vector.broadcast %22 : vector<32x1xf32> to vector<32x8xf32>
    %24 = arith.mulf %14, %23 : vector<32x8xf32>
    %25 = vector.broadcast %7 : vector<1x8xf32> to vector<32x8xf32>
    %26 = arith.mulf %24, %25 : vector<32x8xf32>
    %27 = vector.broadcast %8 : vector<1x8xf32> to vector<32x8xf32>
    %28 = arith.addf %26, %27 : vector<32x8xf32>
    %c0_15 = arith.constant 0 : index
    %c0_16 = arith.constant 0 : index
    %c0_17 = arith.constant 0 : index
    %29 = vector.load %arg4[%c0_15, %c0_16, %c0_17] : memref<2x8x32xf32, #tpu.memory_space<vmem>>, vector<1x8x32xf32>
    %30 = vector.shape_cast %29 : vector<1x8x32xf32> to vector<8x32xf32>
    %cst_18 = arith.constant dense<0.000000e+00> : vector<32x32xf32>
    %31 = tpu.matmul %28, %30, %cst_18 {dimension_numbers = #tpu.dot_dimension_numbers<[1], [0], [0], [1], [0, 0, 1, 1], [], []>} : vector<32x8xf32>, vector<8x32xf32>, vector<32x32xf32> -> vector<32x32xf32>
    %c0_19 = arith.constant 0 : index
    %c0_20 = arith.constant 0 : index
    %c0_21 = arith.constant 0 : index
    %32 = vector.load %arg5[%c0_19, %c0_20, %c0_21] : memref<2x1x32xf32, #tpu.memory_space<vmem>>, vector<1x1x32xf32>
    %33 = vector.shape_cast %32 : vector<1x1x32xf32> to vector<1x32xf32>
    %34 = vector.broadcast %33 : vector<1x32xf32> to vector<32x32xf32>
    %35 = arith.addf %31, %34 : vector<32x32xf32>
    %cst_22 = arith.constant 5.000000e-01 : f32
    %36 = vector.broadcast %cst_22 : f32 to vector<32x32xf32>
    %37 = arith.mulf %36, %35 : vector<32x32xf32>
    %cst_23 = arith.constant 0.707106769 : f32
    %38 = vector.broadcast %cst_23 : f32 to vector<32x32xf32>
    %39 = arith.mulf %35, %38 : vector<32x32xf32>
    %40 = math.absf %39 : vector<32x32xf32>
    %cst_24 = arith.constant 0.327591091 : f32
    %41 = vector.broadcast %cst_24 : f32 to vector<32x32xf32>
    %42 = arith.mulf %41, %40 : vector<32x32xf32>
    %cst_25 = arith.constant 1.000000e+00 : f32
    %43 = vector.broadcast %cst_25 : f32 to vector<32x32xf32>
    %44 = arith.addf %43, %42 : vector<32x32xf32>
    %cst_26 = arith.constant 1.000000e+00 : f32
    %45 = vector.broadcast %cst_26 : f32 to vector<32x32xf32>
    %46 = arith.divf %45, %44 : vector<32x32xf32>
    %cst_27 = arith.constant 1.06140542 : f32
    %47 = vector.broadcast %cst_27 : f32 to vector<32x32xf32>
    %48 = arith.mulf %47, %46 : vector<32x32xf32>
    %cst_28 = arith.constant -1.45315206 : f32
    %49 = vector.broadcast %cst_28 : f32 to vector<32x32xf32>
    %50 = arith.addf %48, %49 : vector<32x32xf32>
    %51 = arith.mulf %50, %46 : vector<32x32xf32>
    %cst_29 = arith.constant 1.42141378 : f32
    %52 = vector.broadcast %cst_29 : f32 to vector<32x32xf32>
    %53 = arith.addf %51, %52 : vector<32x32xf32>
    %54 = arith.mulf %53, %46 : vector<32x32xf32>
    %cst_30 = arith.constant -0.284496725 : f32
    %55 = vector.broadcast %cst_30 : f32 to vector<32x32xf32>
    %56 = arith.addf %54, %55 : vector<32x32xf32>
    %57 = arith.mulf %56, %46 : vector<32x32xf32>
    %cst_31 = arith.constant 0.254829586 : f32
    %58 = vector.broadcast %cst_31 : f32 to vector<32x32xf32>
    %59 = arith.addf %57, %58 : vector<32x32xf32>
    %60 = arith.mulf %59, %46 : vector<32x32xf32>
    %cst_32 = arith.constant 0.000000e+00 : f32
    %61 = vector.broadcast %cst_32 : f32 to vector<32x32xf32>
    %62 = arith.subf %61, %40 : vector<32x32xf32>
    %63 = arith.mulf %62, %40 : vector<32x32xf32>
    %64 = math.exp %63 : vector<32x32xf32>
    %65 = arith.mulf %60, %64 : vector<32x32xf32>
    %cst_33 = arith.constant 1.000000e+00 : f32
    %66 = vector.broadcast %cst_33 : f32 to vector<32x32xf32>
    %67 = arith.subf %66, %65 : vector<32x32xf32>
    %cst_34 = arith.constant 0.000000e+00 : f32
    %68 = vector.broadcast %cst_34 : f32 to vector<32x32xf32>
    %69 = arith.cmpf oge, %39, %68 : vector<32x32xf32>
    %cst_35 = arith.constant 0.000000e+00 : f32
    %70 = vector.broadcast %cst_35 : f32 to vector<32x32xf32>
    %71 = arith.subf %70, %67 : vector<32x32xf32>
    %72 = arith.select %69, %67, %71 : vector<32x32xi1>, vector<32x32xf32>
    %cst_36 = arith.constant 1.000000e+00 : f32
    %73 = vector.broadcast %cst_36 : f32 to vector<32x32xf32>
    %74 = arith.addf %73, %72 : vector<32x32xf32>
    %75 = arith.mulf %37, %74 : vector<32x32xf32>
    %c0_37 = arith.constant 0 : index
    %c0_38 = arith.constant 0 : index
    %c0_39 = arith.constant 0 : index
    %76 = vector.load %arg6[%c0_37, %c0_38, %c0_39] : memref<2x32x8xf32, #tpu.memory_space<vmem>>, vector<1x32x8xf32>
    %77 = vector.shape_cast %76 : vector<1x32x8xf32> to vector<32x8xf32>
    %cst_40 = arith.constant dense<0.000000e+00> : vector<32x8xf32>
    %78 = tpu.matmul %75, %77, %cst_40 {dimension_numbers = #tpu.dot_dimension_numbers<[1], [0], [0], [1], [0, 0, 1, 1], [], []>} : vector<32x32xf32>, vector<32x8xf32>, vector<32x8xf32> -> vector<32x8xf32>
    %c0_41 = arith.constant 0 : index
    %c0_42 = arith.constant 0 : index
    %c0_43 = arith.constant 0 : index
    %79 = vector.load %arg7[%c0_41, %c0_42, %c0_43] : memref<2x1x8xf32, #tpu.memory_space<vmem>>, vector<1x1x8xf32>
    %80 = vector.shape_cast %79 : vector<1x1x8xf32> to vector<1x8xf32>
    %81 = vector.broadcast %80 : vector<1x8xf32> to vector<32x8xf32>
    %82 = arith.addf %78, %81 : vector<32x8xf32>
    %83 = arith.addf %82, %6 : vector<32x8xf32>
    %cst_44 = arith.constant dense<0.000000e+00> : vector<32xf32>
    %84 = vector.multi_reduction <add>, %83, %cst_44 [1] : vector<32x8xf32> to vector<32xf32>
    %85 = vector.shape_cast %84 : vector<32xf32> to vector<32x1xf32>
    %cst_45 = arith.constant 8.000000e+00 : f32
    %86 = vector.broadcast %cst_45 : f32 to vector<32x1xf32>
    %87 = arith.divf %85, %86 : vector<32x1xf32>
    %88 = vector.broadcast %87 : vector<32x1xf32> to vector<32x8xf32>
    %89 = arith.subf %83, %88 : vector<32x8xf32>
    %90 = arith.mulf %89, %89 : vector<32x8xf32>
    %cst_46 = arith.constant dense<0.000000e+00> : vector<32xf32>
    %91 = vector.multi_reduction <add>, %90, %cst_46 [1] : vector<32x8xf32> to vector<32xf32>
    %92 = vector.shape_cast %91 : vector<32xf32> to vector<32x1xf32>
    %cst_47 = arith.constant 8.000000e+00 : f32
    %93 = vector.broadcast %cst_47 : f32 to vector<32x1xf32>
    %94 = arith.divf %92, %93 : vector<32x1xf32>
    %cst_48 = arith.constant 9.99999974E-6 : f32
    %95 = vector.broadcast %cst_48 : f32 to vector<32x1xf32>
    %96 = arith.addf %94, %95 : vector<32x1xf32>
    %97 = math.rsqrt %96 : vector<32x1xf32>
    %98 = vector.broadcast %97 : vector<32x1xf32> to vector<32x8xf32>
    %99 = arith.mulf %89, %98 : vector<32x8xf32>
    %100 = vector.broadcast %7 : vector<1x8xf32> to vector<32x8xf32>
    %101 = arith.mulf %99, %100 : vector<32x8xf32>
    %102 = vector.broadcast %8 : vector<1x8xf32> to vector<32x8xf32>
    %103 = arith.addf %101, %102 : vector<32x8xf32>
    %c0_49 = arith.constant 0 : index
    %c0_50 = arith.constant 0 : index
    %c0_51 = arith.constant 0 : index
    %104 = vector.load %arg8[%c0_49, %c0_50, %c0_51] : memref<2x32x16xf32, #tpu.memory_space<vmem>>, vector<1x32x16xf32>
    %105 = vector.shape_cast %104 : vector<1x32x16xf32> to vector<32x16xf32>
    %c0_52 = arith.constant 0 : index
    %c0_53 = arith.constant 0 : index
    %c0_54 = arith.constant 0 : index
    %106 = vector.load %arg9[%c0_52, %c0_53, %c0_54] : memref<2x32x8xf32, #tpu.memory_space<vmem>>, vector<1x32x8xf32>
    %107 = vector.shape_cast %106 : vector<1x32x8xf32> to vector<32x8xf32>
    %c0_55 = arith.constant 0 : index
    %c0_56 = arith.constant 0 : index
    %c0_57 = arith.constant 0 : index
    %108 = vector.load %arg10[%c0_55, %c0_56, %c0_57] : memref<2x16x32xf32, #tpu.memory_space<vmem>>, vector<1x16x32xf32>
    %109 = vector.shape_cast %108 : vector<1x16x32xf32> to vector<16x32xf32>
    %c0_58 = arith.constant 0 : index
    %c0_59 = arith.constant 0 : index
    %c0_60 = arith.constant 0 : index
    %110 = vector.load %arg11[%c0_58, %c0_59, %c0_60] : memref<2x16x8xf32, #tpu.memory_space<vmem>>, vector<1x16x8xf32>
    %111 = vector.shape_cast %110 : vector<1x16x8xf32> to vector<16x8xf32>
    %112 = vector.extract_strided_slice %103 {offsets = [0, 0], sizes = [16, 8], strides = [1, 1]} : vector<32x8xf32> to vector<16x8xf32>
    %cst_61 = arith.constant dense<0.000000e+00> : vector<32x8xf32>
    %113 = tpu.matmul %105, %112, %cst_61 {dimension_numbers = #tpu.dot_dimension_numbers<[1], [0], [0], [1], [0, 0, 1, 1], [], []>} : vector<32x16xf32>, vector<16x8xf32>, vector<32x8xf32> -> vector<32x8xf32>
    %114 = arith.addf %113, %107 : vector<32x8xf32>
    %cst_62 = arith.constant 5.000000e-01 : f32
    %115 = vector.broadcast %cst_62 : f32 to vector<32x8xf32>
    %116 = arith.mulf %115, %114 : vector<32x8xf32>
    %cst_63 = arith.constant 0.707106769 : f32
    %117 = vector.broadcast %cst_63 : f32 to vector<32x8xf32>
    %118 = arith.mulf %114, %117 : vector<32x8xf32>
    %119 = math.absf %118 : vector<32x8xf32>
    %cst_64 = arith.constant 0.327591091 : f32
    %120 = vector.broadcast %cst_64 : f32 to vector<32x8xf32>
    %121 = arith.mulf %120, %119 : vector<32x8xf32>
    %cst_65 = arith.constant 1.000000e+00 : f32
    %122 = vector.broadcast %cst_65 : f32 to vector<32x8xf32>
    %123 = arith.addf %122, %121 : vector<32x8xf32>
    %cst_66 = arith.constant 1.000000e+00 : f32
    %124 = vector.broadcast %cst_66 : f32 to vector<32x8xf32>
    %125 = arith.divf %124, %123 : vector<32x8xf32>
    %cst_67 = arith.constant 1.06140542 : f32
    %126 = vector.broadcast %cst_67 : f32 to vector<32x8xf32>
    %127 = arith.mulf %126, %125 : vector<32x8xf32>
    %cst_68 = arith.constant -1.45315206 : f32
    %128 = vector.broadcast %cst_68 : f32 to vector<32x8xf32>
    %129 = arith.addf %127, %128 : vector<32x8xf32>
    %130 = arith.mulf %129, %125 : vector<32x8xf32>
    %cst_69 = arith.constant 1.42141378 : f32
    %131 = vector.broadcast %cst_69 : f32 to vector<32x8xf32>
    %132 = arith.addf %130, %131 : vector<32x8xf32>
    %133 = arith.mulf %132, %125 : vector<32x8xf32>
    %cst_70 = arith.constant -0.284496725 : f32
    %134 = vector.broadcast %cst_70 : f32 to vector<32x8xf32>
    %135 = arith.addf %133, %134 : vector<32x8xf32>
    %136 = arith.mulf %135, %125 : vector<32x8xf32>
    %cst_71 = arith.constant 0.254829586 : f32
    %137 = vector.broadcast %cst_71 : f32 to vector<32x8xf32>
    %138 = arith.addf %136, %137 : vector<32x8xf32>
    %139 = arith.mulf %138, %125 : vector<32x8xf32>
    %cst_72 = arith.constant 0.000000e+00 : f32
    %140 = vector.broadcast %cst_72 : f32 to vector<32x8xf32>
    %141 = arith.subf %140, %119 : vector<32x8xf32>
    %142 = arith.mulf %141, %119 : vector<32x8xf32>
    %143 = math.exp %142 : vector<32x8xf32>
    %144 = arith.mulf %139, %143 : vector<32x8xf32>
    %cst_73 = arith.constant 1.000000e+00 : f32
    %145 = vector.broadcast %cst_73 : f32 to vector<32x8xf32>
    %146 = arith.subf %145, %144 : vector<32x8xf32>
    %cst_74 = arith.constant 0.000000e+00 : f32
    %147 = vector.broadcast %cst_74 : f32 to vector<32x8xf32>
    %148 = arith.cmpf oge, %118, %147 : vector<32x8xf32>
    %cst_75 = arith.constant 0.000000e+00 : f32
    %149 = vector.broadcast %cst_75 : f32 to vector<32x8xf32>
    %150 = arith.subf %149, %146 : vector<32x8xf32>
    %151 = arith.select %148, %146, %150 : vector<32x8xi1>, vector<32x8xf32>
    %cst_76 = arith.constant 1.000000e+00 : f32
    %152 = vector.broadcast %cst_76 : f32 to vector<32x8xf32>
    %153 = arith.addf %152, %151 : vector<32x8xf32>
    %154 = arith.mulf %116, %153 : vector<32x8xf32>
    %cst_77 = arith.constant dense<0.000000e+00> : vector<16x8xf32>
    %155 = tpu.matmul %109, %154, %cst_77 {dimension_numbers = #tpu.dot_dimension_numbers<[1], [0], [0], [1], [0, 0, 1, 1], [], []>} : vector<16x32xf32>, vector<32x8xf32>, vector<16x8xf32> -> vector<16x8xf32>
    %156 = arith.addf %155, %111 : vector<16x8xf32>
    %157 = arith.addf %156, %112 : vector<16x8xf32>
    %158 = vector.extract_strided_slice %103 {offsets = [16, 0], sizes = [16, 8], strides = [1, 1]} : vector<32x8xf32> to vector<16x8xf32>
    %cst_78 = arith.constant dense<0.000000e+00> : vector<32x8xf32>
    %159 = tpu.matmul %105, %158, %cst_78 {dimension_numbers = #tpu.dot_dimension_numbers<[1], [0], [0], [1], [0, 0, 1, 1], [], []>} : vector<32x16xf32>, vector<16x8xf32>, vector<32x8xf32> -> vector<32x8xf32>
    %160 = arith.addf %159, %107 : vector<32x8xf32>
    %cst_79 = arith.constant 5.000000e-01 : f32
    %161 = vector.broadcast %cst_79 : f32 to vector<32x8xf32>
    %162 = arith.mulf %161, %160 : vector<32x8xf32>
    %cst_80 = arith.constant 0.707106769 : f32
    %163 = vector.broadcast %cst_80 : f32 to vector<32x8xf32>
    %164 = arith.mulf %160, %163 : vector<32x8xf32>
    %165 = math.absf %164 : vector<32x8xf32>
    %cst_81 = arith.constant 0.327591091 : f32
    %166 = vector.broadcast %cst_81 : f32 to vector<32x8xf32>
    %167 = arith.mulf %166, %165 : vector<32x8xf32>
    %cst_82 = arith.constant 1.000000e+00 : f32
    %168 = vector.broadcast %cst_82 : f32 to vector<32x8xf32>
    %169 = arith.addf %168, %167 : vector<32x8xf32>
    %cst_83 = arith.constant 1.000000e+00 : f32
    %170 = vector.broadcast %cst_83 : f32 to vector<32x8xf32>
    %171 = arith.divf %170, %169 : vector<32x8xf32>
    %cst_84 = arith.constant 1.06140542 : f32
    %172 = vector.broadcast %cst_84 : f32 to vector<32x8xf32>
    %173 = arith.mulf %172, %171 : vector<32x8xf32>
    %cst_85 = arith.constant -1.45315206 : f32
    %174 = vector.broadcast %cst_85 : f32 to vector<32x8xf32>
    %175 = arith.addf %173, %174 : vector<32x8xf32>
    %176 = arith.mulf %175, %171 : vector<32x8xf32>
    %cst_86 = arith.constant 1.42141378 : f32
    %177 = vector.broadcast %cst_86 : f32 to vector<32x8xf32>
    %178 = arith.addf %176, %177 : vector<32x8xf32>
    %179 = arith.mulf %178, %171 : vector<32x8xf32>
    %cst_87 = arith.constant -0.284496725 : f32
    %180 = vector.broadcast %cst_87 : f32 to vector<32x8xf32>
    %181 = arith.addf %179, %180 : vector<32x8xf32>
    %182 = arith.mulf %181, %171 : vector<32x8xf32>
    %cst_88 = arith.constant 0.254829586 : f32
    %183 = vector.broadcast %cst_88 : f32 to vector<32x8xf32>
    %184 = arith.addf %182, %183 : vector<32x8xf32>
    %185 = arith.mulf %184, %171 : vector<32x8xf32>
    %cst_89 = arith.constant 0.000000e+00 : f32
    %186 = vector.broadcast %cst_89 : f32 to vector<32x8xf32>
    %187 = arith.subf %186, %165 : vector<32x8xf32>
    %188 = arith.mulf %187, %165 : vector<32x8xf32>
    %189 = math.exp %188 : vector<32x8xf32>
    %190 = arith.mulf %185, %189 : vector<32x8xf32>
    %cst_90 = arith.constant 1.000000e+00 : f32
    %191 = vector.broadcast %cst_90 : f32 to vector<32x8xf32>
    %192 = arith.subf %191, %190 : vector<32x8xf32>
    %cst_91 = arith.constant 0.000000e+00 : f32
    %193 = vector.broadcast %cst_91 : f32 to vector<32x8xf32>
    %194 = arith.cmpf oge, %164, %193 : vector<32x8xf32>
    %cst_92 = arith.constant 0.000000e+00 : f32
    %195 = vector.broadcast %cst_92 : f32 to vector<32x8xf32>
    %196 = arith.subf %195, %192 : vector<32x8xf32>
    %197 = arith.select %194, %192, %196 : vector<32x8xi1>, vector<32x8xf32>
    %cst_93 = arith.constant 1.000000e+00 : f32
    %198 = vector.broadcast %cst_93 : f32 to vector<32x8xf32>
    %199 = arith.addf %198, %197 : vector<32x8xf32>
    %200 = arith.mulf %162, %199 : vector<32x8xf32>
    %cst_94 = arith.constant dense<0.000000e+00> : vector<16x8xf32>
    %201 = tpu.matmul %109, %200, %cst_94 {dimension_numbers = #tpu.dot_dimension_numbers<[1], [0], [0], [1], [0, 0, 1, 1], [], []>} : vector<16x32xf32>, vector<32x8xf32>, vector<16x8xf32> -> vector<16x8xf32>
    %202 = arith.addf %201, %111 : vector<16x8xf32>
    %203 = arith.addf %202, %158 : vector<16x8xf32>
    %204 = tpu.concatenate %157, %203 in 0 : vector<16x8xf32>, vector<16x8xf32> -> vector<32x8xf32>
    %cst_95 = arith.constant dense<0.000000e+00> : vector<32xf32>
    %205 = vector.multi_reduction <add>, %204, %cst_95 [1] : vector<32x8xf32> to vector<32xf32>
    %206 = vector.shape_cast %205 : vector<32xf32> to vector<32x1xf32>
    %cst_96 = arith.constant 8.000000e+00 : f32
    %207 = vector.broadcast %cst_96 : f32 to vector<32x1xf32>
    %208 = arith.divf %206, %207 : vector<32x1xf32>
    %209 = vector.broadcast %208 : vector<32x1xf32> to vector<32x8xf32>
    %210 = arith.subf %204, %209 : vector<32x8xf32>
    %211 = arith.mulf %210, %210 : vector<32x8xf32>
    %cst_97 = arith.constant dense<0.000000e+00> : vector<32xf32>
    %212 = vector.multi_reduction <add>, %211, %cst_97 [1] : vector<32x8xf32> to vector<32xf32>
    %213 = vector.shape_cast %212 : vector<32xf32> to vector<32x1xf32>
    %cst_98 = arith.constant 8.000000e+00 : f32
    %214 = vector.broadcast %cst_98 : f32 to vector<32x1xf32>
    %215 = arith.divf %213, %214 : vector<32x1xf32>
    %cst_99 = arith.constant 9.99999974E-6 : f32
    %216 = vector.broadcast %cst_99 : f32 to vector<32x1xf32>
    %217 = arith.addf %215, %216 : vector<32x1xf32>
    %218 = math.rsqrt %217 : vector<32x1xf32>
    %219 = vector.broadcast %218 : vector<32x1xf32> to vector<32x8xf32>
    %220 = arith.mulf %210, %219 : vector<32x8xf32>
    %221 = vector.broadcast %7 : vector<1x8xf32> to vector<32x8xf32>
    %222 = arith.mulf %220, %221 : vector<32x8xf32>
    %223 = vector.broadcast %8 : vector<1x8xf32> to vector<32x8xf32>
    %224 = arith.addf %222, %223 : vector<32x8xf32>
    %c1 = arith.constant 1 : index
    %c0_100 = arith.constant 0 : index
    %c0_101 = arith.constant 0 : index
    %225 = vector.load %arg4[%c1, %c0_100, %c0_101] : memref<2x8x32xf32, #tpu.memory_space<vmem>>, vector<1x8x32xf32>
    %226 = vector.shape_cast %225 : vector<1x8x32xf32> to vector<8x32xf32>
    %cst_102 = arith.constant dense<0.000000e+00> : vector<32x32xf32>
    %227 = tpu.matmul %224, %226, %cst_102 {dimension_numbers = #tpu.dot_dimension_numbers<[1], [0], [0], [1], [0, 0, 1, 1], [], []>} : vector<32x8xf32>, vector<8x32xf32>, vector<32x32xf32> -> vector<32x32xf32>
    %c1_103 = arith.constant 1 : index
    %c0_104 = arith.constant 0 : index
    %c0_105 = arith.constant 0 : index
    %228 = vector.load %arg5[%c1_103, %c0_104, %c0_105] : memref<2x1x32xf32, #tpu.memory_space<vmem>>, vector<1x1x32xf32>
    %229 = vector.shape_cast %228 : vector<1x1x32xf32> to vector<1x32xf32>
    %230 = vector.broadcast %229 : vector<1x32xf32> to vector<32x32xf32>
    %231 = arith.addf %227, %230 : vector<32x32xf32>
    %cst_106 = arith.constant 5.000000e-01 : f32
    %232 = vector.broadcast %cst_106 : f32 to vector<32x32xf32>
    %233 = arith.mulf %232, %231 : vector<32x32xf32>
    %cst_107 = arith.constant 0.707106769 : f32
    %234 = vector.broadcast %cst_107 : f32 to vector<32x32xf32>
    %235 = arith.mulf %231, %234 : vector<32x32xf32>
    %236 = math.absf %235 : vector<32x32xf32>
    %cst_108 = arith.constant 0.327591091 : f32
    %237 = vector.broadcast %cst_108 : f32 to vector<32x32xf32>
    %238 = arith.mulf %237, %236 : vector<32x32xf32>
    %cst_109 = arith.constant 1.000000e+00 : f32
    %239 = vector.broadcast %cst_109 : f32 to vector<32x32xf32>
    %240 = arith.addf %239, %238 : vector<32x32xf32>
    %cst_110 = arith.constant 1.000000e+00 : f32
    %241 = vector.broadcast %cst_110 : f32 to vector<32x32xf32>
    %242 = arith.divf %241, %240 : vector<32x32xf32>
    %cst_111 = arith.constant 1.06140542 : f32
    %243 = vector.broadcast %cst_111 : f32 to vector<32x32xf32>
    %244 = arith.mulf %243, %242 : vector<32x32xf32>
    %cst_112 = arith.constant -1.45315206 : f32
    %245 = vector.broadcast %cst_112 : f32 to vector<32x32xf32>
    %246 = arith.addf %244, %245 : vector<32x32xf32>
    %247 = arith.mulf %246, %242 : vector<32x32xf32>
    %cst_113 = arith.constant 1.42141378 : f32
    %248 = vector.broadcast %cst_113 : f32 to vector<32x32xf32>
    %249 = arith.addf %247, %248 : vector<32x32xf32>
    %250 = arith.mulf %249, %242 : vector<32x32xf32>
    %cst_114 = arith.constant -0.284496725 : f32
    %251 = vector.broadcast %cst_114 : f32 to vector<32x32xf32>
    %252 = arith.addf %250, %251 : vector<32x32xf32>
    %253 = arith.mulf %252, %242 : vector<32x32xf32>
    %cst_115 = arith.constant 0.254829586 : f32
    %254 = vector.broadcast %cst_115 : f32 to vector<32x32xf32>
    %255 = arith.addf %253, %254 : vector<32x32xf32>
    %256 = arith.mulf %255, %242 : vector<32x32xf32>
    %cst_116 = arith.constant 0.000000e+00 : f32
    %257 = vector.broadcast %cst_116 : f32 to vector<32x32xf32>
    %258 = arith.subf %257, %236 : vector<32x32xf32>
    %259 = arith.mulf %258, %236 : vector<32x32xf32>
    %260 = math.exp %259 : vector<32x32xf32>
    %261 = arith.mulf %256, %260 : vector<32x32xf32>
    %cst_117 = arith.constant 1.000000e+00 : f32
    %262 = vector.broadcast %cst_117 : f32 to vector<32x32xf32>
    %263 = arith.subf %262, %261 : vector<32x32xf32>
    %cst_118 = arith.constant 0.000000e+00 : f32
    %264 = vector.broadcast %cst_118 : f32 to vector<32x32xf32>
    %265 = arith.cmpf oge, %235, %264 : vector<32x32xf32>
    %cst_119 = arith.constant 0.000000e+00 : f32
    %266 = vector.broadcast %cst_119 : f32 to vector<32x32xf32>
    %267 = arith.subf %266, %263 : vector<32x32xf32>
    %268 = arith.select %265, %263, %267 : vector<32x32xi1>, vector<32x32xf32>
    %cst_120 = arith.constant 1.000000e+00 : f32
    %269 = vector.broadcast %cst_120 : f32 to vector<32x32xf32>
    %270 = arith.addf %269, %268 : vector<32x32xf32>
    %271 = arith.mulf %233, %270 : vector<32x32xf32>
    %c1_121 = arith.constant 1 : index
    %c0_122 = arith.constant 0 : index
    %c0_123 = arith.constant 0 : index
    %272 = vector.load %arg6[%c1_121, %c0_122, %c0_123] : memref<2x32x8xf32, #tpu.memory_space<vmem>>, vector<1x32x8xf32>
    %273 = vector.shape_cast %272 : vector<1x32x8xf32> to vector<32x8xf32>
    %cst_124 = arith.constant dense<0.000000e+00> : vector<32x8xf32>
    %274 = tpu.matmul %271, %273, %cst_124 {dimension_numbers = #tpu.dot_dimension_numbers<[1], [0], [0], [1], [0, 0, 1, 1], [], []>} : vector<32x32xf32>, vector<32x8xf32>, vector<32x8xf32> -> vector<32x8xf32>
    %c1_125 = arith.constant 1 : index
    %c0_126 = arith.constant 0 : index
    %c0_127 = arith.constant 0 : index
    %275 = vector.load %arg7[%c1_125, %c0_126, %c0_127] : memref<2x1x8xf32, #tpu.memory_space<vmem>>, vector<1x1x8xf32>
    %276 = vector.shape_cast %275 : vector<1x1x8xf32> to vector<1x8xf32>
    %277 = vector.broadcast %276 : vector<1x8xf32> to vector<32x8xf32>
    %278 = arith.addf %274, %277 : vector<32x8xf32>
    %279 = arith.addf %278, %204 : vector<32x8xf32>
    %cst_128 = arith.constant dense<0.000000e+00> : vector<32xf32>
    %280 = vector.multi_reduction <add>, %279, %cst_128 [1] : vector<32x8xf32> to vector<32xf32>
    %281 = vector.shape_cast %280 : vector<32xf32> to vector<32x1xf32>
    %cst_129 = arith.constant 8.000000e+00 : f32
    %282 = vector.broadcast %cst_129 : f32 to vector<32x1xf32>
    %283 = arith.divf %281, %282 : vector<32x1xf32>
    %284 = vector.broadcast %283 : vector<32x1xf32> to vector<32x8xf32>
    %285 = arith.subf %279, %284 : vector<32x8xf32>
    %286 = arith.mulf %285, %285 : vector<32x8xf32>
    %cst_130 = arith.constant dense<0.000000e+00> : vector<32xf32>
    %287 = vector.multi_reduction <add>, %286, %cst_130 [1] : vector<32x8xf32> to vector<32xf32>
    %288 = vector.shape_cast %287 : vector<32xf32> to vector<32x1xf32>
    %cst_131 = arith.constant 8.000000e+00 : f32
    %289 = vector.broadcast %cst_131 : f32 to vector<32x1xf32>
    %290 = arith.divf %288, %289 : vector<32x1xf32>
    %cst_132 = arith.constant 9.99999974E-6 : f32
    %291 = vector.broadcast %cst_132 : f32 to vector<32x1xf32>
    %292 = arith.addf %290, %291 : vector<32x1xf32>
    %293 = math.rsqrt %292 : vector<32x1xf32>
    %294 = vector.broadcast %293 : vector<32x1xf32> to vector<32x8xf32>
    %295 = arith.mulf %285, %294 : vector<32x8xf32>
    %296 = vector.broadcast %7 : vector<1x8xf32> to vector<32x8xf32>
    %297 = arith.mulf %295, %296 : vector<32x8xf32>
    %298 = vector.broadcast %8 : vector<1x8xf32> to vector<32x8xf32>
    %299 = arith.addf %297, %298 : vector<32x8xf32>
    %c1_133 = arith.constant 1 : index
    %c0_134 = arith.constant 0 : index
    %c0_135 = arith.constant 0 : index
    %300 = vector.load %arg8[%c1_133, %c0_134, %c0_135] : memref<2x32x16xf32, #tpu.memory_space<vmem>>, vector<1x32x16xf32>
    %301 = vector.shape_cast %300 : vector<1x32x16xf32> to vector<32x16xf32>
    %c1_136 = arith.constant 1 : index
    %c0_137 = arith.constant 0 : index
    %c0_138 = arith.constant 0 : index
    %302 = vector.load %arg9[%c1_136, %c0_137, %c0_138] : memref<2x32x8xf32, #tpu.memory_space<vmem>>, vector<1x32x8xf32>
    %303 = vector.shape_cast %302 : vector<1x32x8xf32> to vector<32x8xf32>
    %c1_139 = arith.constant 1 : index
    %c0_140 = arith.constant 0 : index
    %c0_141 = arith.constant 0 : index
    %304 = vector.load %arg10[%c1_139, %c0_140, %c0_141] : memref<2x16x32xf32, #tpu.memory_space<vmem>>, vector<1x16x32xf32>
    %305 = vector.shape_cast %304 : vector<1x16x32xf32> to vector<16x32xf32>
    %c1_142 = arith.constant 1 : index
    %c0_143 = arith.constant 0 : index
    %c0_144 = arith.constant 0 : index
    %306 = vector.load %arg11[%c1_142, %c0_143, %c0_144] : memref<2x16x8xf32, #tpu.memory_space<vmem>>, vector<1x16x8xf32>
    %307 = vector.shape_cast %306 : vector<1x16x8xf32> to vector<16x8xf32>
    %308 = vector.extract_strided_slice %299 {offsets = [0, 0], sizes = [16, 8], strides = [1, 1]} : vector<32x8xf32> to vector<16x8xf32>
    %cst_145 = arith.constant dense<0.000000e+00> : vector<32x8xf32>
    %309 = tpu.matmul %301, %308, %cst_145 {dimension_numbers = #tpu.dot_dimension_numbers<[1], [0], [0], [1], [0, 0, 1, 1], [], []>} : vector<32x16xf32>, vector<16x8xf32>, vector<32x8xf32> -> vector<32x8xf32>
    %310 = arith.addf %309, %303 : vector<32x8xf32>
    %cst_146 = arith.constant 5.000000e-01 : f32
    %311 = vector.broadcast %cst_146 : f32 to vector<32x8xf32>
    %312 = arith.mulf %311, %310 : vector<32x8xf32>
    %cst_147 = arith.constant 0.707106769 : f32
    %313 = vector.broadcast %cst_147 : f32 to vector<32x8xf32>
    %314 = arith.mulf %310, %313 : vector<32x8xf32>
    %315 = math.absf %314 : vector<32x8xf32>
    %cst_148 = arith.constant 0.327591091 : f32
    %316 = vector.broadcast %cst_148 : f32 to vector<32x8xf32>
    %317 = arith.mulf %316, %315 : vector<32x8xf32>
    %cst_149 = arith.constant 1.000000e+00 : f32
    %318 = vector.broadcast %cst_149 : f32 to vector<32x8xf32>
    %319 = arith.addf %318, %317 : vector<32x8xf32>
    %cst_150 = arith.constant 1.000000e+00 : f32
    %320 = vector.broadcast %cst_150 : f32 to vector<32x8xf32>
    %321 = arith.divf %320, %319 : vector<32x8xf32>
    %cst_151 = arith.constant 1.06140542 : f32
    %322 = vector.broadcast %cst_151 : f32 to vector<32x8xf32>
    %323 = arith.mulf %322, %321 : vector<32x8xf32>
    %cst_152 = arith.constant -1.45315206 : f32
    %324 = vector.broadcast %cst_152 : f32 to vector<32x8xf32>
    %325 = arith.addf %323, %324 : vector<32x8xf32>
    %326 = arith.mulf %325, %321 : vector<32x8xf32>
    %cst_153 = arith.constant 1.42141378 : f32
    %327 = vector.broadcast %cst_153 : f32 to vector<32x8xf32>
    %328 = arith.addf %326, %327 : vector<32x8xf32>
    %329 = arith.mulf %328, %321 : vector<32x8xf32>
    %cst_154 = arith.constant -0.284496725 : f32
    %330 = vector.broadcast %cst_154 : f32 to vector<32x8xf32>
    %331 = arith.addf %329, %330 : vector<32x8xf32>
    %332 = arith.mulf %331, %321 : vector<32x8xf32>
    %cst_155 = arith.constant 0.254829586 : f32
    %333 = vector.broadcast %cst_155 : f32 to vector<32x8xf32>
    %334 = arith.addf %332, %333 : vector<32x8xf32>
    %335 = arith.mulf %334, %321 : vector<32x8xf32>
    %cst_156 = arith.constant 0.000000e+00 : f32
    %336 = vector.broadcast %cst_156 : f32 to vector<32x8xf32>
    %337 = arith.subf %336, %315 : vector<32x8xf32>
    %338 = arith.mulf %337, %315 : vector<32x8xf32>
    %339 = math.exp %338 : vector<32x8xf32>
    %340 = arith.mulf %335, %339 : vector<32x8xf32>
    %cst_157 = arith.constant 1.000000e+00 : f32
    %341 = vector.broadcast %cst_157 : f32 to vector<32x8xf32>
    %342 = arith.subf %341, %340 : vector<32x8xf32>
    %cst_158 = arith.constant 0.000000e+00 : f32
    %343 = vector.broadcast %cst_158 : f32 to vector<32x8xf32>
    %344 = arith.cmpf oge, %314, %343 : vector<32x8xf32>
    %cst_159 = arith.constant 0.000000e+00 : f32
    %345 = vector.broadcast %cst_159 : f32 to vector<32x8xf32>
    %346 = arith.subf %345, %342 : vector<32x8xf32>
    %347 = arith.select %344, %342, %346 : vector<32x8xi1>, vector<32x8xf32>
    %cst_160 = arith.constant 1.000000e+00 : f32
    %348 = vector.broadcast %cst_160 : f32 to vector<32x8xf32>
    %349 = arith.addf %348, %347 : vector<32x8xf32>
    %350 = arith.mulf %312, %349 : vector<32x8xf32>
    %cst_161 = arith.constant dense<0.000000e+00> : vector<16x8xf32>
    %351 = tpu.matmul %305, %350, %cst_161 {dimension_numbers = #tpu.dot_dimension_numbers<[1], [0], [0], [1], [0, 0, 1, 1], [], []>} : vector<16x32xf32>, vector<32x8xf32>, vector<16x8xf32> -> vector<16x8xf32>
    %352 = arith.addf %351, %307 : vector<16x8xf32>
    %353 = arith.addf %352, %308 : vector<16x8xf32>
    %354 = vector.extract_strided_slice %299 {offsets = [16, 0], sizes = [16, 8], strides = [1, 1]} : vector<32x8xf32> to vector<16x8xf32>
    %cst_162 = arith.constant dense<0.000000e+00> : vector<32x8xf32>
    %355 = tpu.matmul %301, %354, %cst_162 {dimension_numbers = #tpu.dot_dimension_numbers<[1], [0], [0], [1], [0, 0, 1, 1], [], []>} : vector<32x16xf32>, vector<16x8xf32>, vector<32x8xf32> -> vector<32x8xf32>
    %356 = arith.addf %355, %303 : vector<32x8xf32>
    %cst_163 = arith.constant 5.000000e-01 : f32
    %357 = vector.broadcast %cst_163 : f32 to vector<32x8xf32>
    %358 = arith.mulf %357, %356 : vector<32x8xf32>
    %cst_164 = arith.constant 0.707106769 : f32
    %359 = vector.broadcast %cst_164 : f32 to vector<32x8xf32>
    %360 = arith.mulf %356, %359 : vector<32x8xf32>
    %361 = math.absf %360 : vector<32x8xf32>
    %cst_165 = arith.constant 0.327591091 : f32
    %362 = vector.broadcast %cst_165 : f32 to vector<32x8xf32>
    %363 = arith.mulf %362, %361 : vector<32x8xf32>
    %cst_166 = arith.constant 1.000000e+00 : f32
    %364 = vector.broadcast %cst_166 : f32 to vector<32x8xf32>
    %365 = arith.addf %364, %363 : vector<32x8xf32>
    %cst_167 = arith.constant 1.000000e+00 : f32
    %366 = vector.broadcast %cst_167 : f32 to vector<32x8xf32>
    %367 = arith.divf %366, %365 : vector<32x8xf32>
    %cst_168 = arith.constant 1.06140542 : f32
    %368 = vector.broadcast %cst_168 : f32 to vector<32x8xf32>
    %369 = arith.mulf %368, %367 : vector<32x8xf32>
    %cst_169 = arith.constant -1.45315206 : f32
    %370 = vector.broadcast %cst_169 : f32 to vector<32x8xf32>
    %371 = arith.addf %369, %370 : vector<32x8xf32>
    %372 = arith.mulf %371, %367 : vector<32x8xf32>
    %cst_170 = arith.constant 1.42141378 : f32
    %373 = vector.broadcast %cst_170 : f32 to vector<32x8xf32>
    %374 = arith.addf %372, %373 : vector<32x8xf32>
    %375 = arith.mulf %374, %367 : vector<32x8xf32>
    %cst_171 = arith.constant -0.284496725 : f32
    %376 = vector.broadcast %cst_171 : f32 to vector<32x8xf32>
    %377 = arith.addf %375, %376 : vector<32x8xf32>
    %378 = arith.mulf %377, %367 : vector<32x8xf32>
    %cst_172 = arith.constant 0.254829586 : f32
    %379 = vector.broadcast %cst_172 : f32 to vector<32x8xf32>
    %380 = arith.addf %378, %379 : vector<32x8xf32>
    %381 = arith.mulf %380, %367 : vector<32x8xf32>
    %cst_173 = arith.constant 0.000000e+00 : f32
    %382 = vector.broadcast %cst_173 : f32 to vector<32x8xf32>
    %383 = arith.subf %382, %361 : vector<32x8xf32>
    %384 = arith.mulf %383, %361 : vector<32x8xf32>
    %385 = math.exp %384 : vector<32x8xf32>
    %386 = arith.mulf %381, %385 : vector<32x8xf32>
    %cst_174 = arith.constant 1.000000e+00 : f32
    %387 = vector.broadcast %cst_174 : f32 to vector<32x8xf32>
    %388 = arith.subf %387, %386 : vector<32x8xf32>
    %cst_175 = arith.constant 0.000000e+00 : f32
    %389 = vector.broadcast %cst_175 : f32 to vector<32x8xf32>
    %390 = arith.cmpf oge, %360, %389 : vector<32x8xf32>
    %cst_176 = arith.constant 0.000000e+00 : f32
    %391 = vector.broadcast %cst_176 : f32 to vector<32x8xf32>
    %392 = arith.subf %391, %388 : vector<32x8xf32>
    %393 = arith.select %390, %388, %392 : vector<32x8xi1>, vector<32x8xf32>
    %cst_177 = arith.constant 1.000000e+00 : f32
    %394 = vector.broadcast %cst_177 : f32 to vector<32x8xf32>
    %395 = arith.addf %394, %393 : vector<32x8xf32>
    %396 = arith.mulf %358, %395 : vector<32x8xf32>
    %cst_178 = arith.constant dense<0.000000e+00> : vector<16x8xf32>
    %397 = tpu.matmul %305, %396, %cst_178 {dimension_numbers = #tpu.dot_dimension_numbers<[1], [0], [0], [1], [0, 0, 1, 1], [], []>} : vector<16x32xf32>, vector<32x8xf32>, vector<16x8xf32> -> vector<16x8xf32>
    %398 = arith.addf %397, %307 : vector<16x8xf32>
    %399 = arith.addf %398, %354 : vector<16x8xf32>
    %400 = tpu.concatenate %353, %399 in 0 : vector<16x8xf32>, vector<16x8xf32> -> vector<32x8xf32>
    %c0_179 = arith.constant 0 : index
    %c0_180 = arith.constant 0 : index
    %401 = vector.load %arg14[%c0_179, %c0_180] : memref<16x8xf32, #tpu.memory_space<vmem>>, vector<16x8xf32>
    %c0_181 = arith.constant 0 : index
    %c0_182 = arith.constant 0 : index
    %402 = vector.load %arg15[%c0_181, %c0_182] : memref<16x8xf32, #tpu.memory_space<vmem>>, vector<16x8xf32>
    %403 = vector.extract_strided_slice %400 {offsets = [0, 0], sizes = [16, 8], strides = [1, 1]} : vector<32x8xf32> to vector<16x8xf32>
    %cst_183 = arith.constant dense<0.000000e+00> : vector<8xf32>
    %404 = vector.multi_reduction <add>, %403, %cst_183 [0] : vector<16x8xf32> to vector<8xf32>
    %405 = vector.shape_cast %404 : vector<8xf32> to vector<1x8xf32>
    %cst_184 = arith.constant 1.600000e+01 : f32
    %406 = vector.broadcast %cst_184 : f32 to vector<1x8xf32>
    %407 = arith.divf %405, %406 : vector<1x8xf32>
    %408 = vector.broadcast %407 : vector<1x8xf32> to vector<16x8xf32>
    %409 = arith.subf %403, %408 : vector<16x8xf32>
    %410 = arith.mulf %409, %409 : vector<16x8xf32>
    %cst_185 = arith.constant dense<0.000000e+00> : vector<8xf32>
    %411 = vector.multi_reduction <add>, %410, %cst_185 [0] : vector<16x8xf32> to vector<8xf32>
    %412 = vector.shape_cast %411 : vector<8xf32> to vector<1x8xf32>
    %cst_186 = arith.constant 1.600000e+01 : f32
    %413 = vector.broadcast %cst_186 : f32 to vector<1x8xf32>
    %414 = arith.divf %412, %413 : vector<1x8xf32>
    %cst_187 = arith.constant 9.99999974E-6 : f32
    %415 = vector.broadcast %cst_187 : f32 to vector<1x8xf32>
    %416 = arith.addf %414, %415 : vector<1x8xf32>
    %417 = math.rsqrt %416 : vector<1x8xf32>
    %418 = vector.broadcast %417 : vector<1x8xf32> to vector<16x8xf32>
    %419 = arith.mulf %409, %418 : vector<16x8xf32>
    %420 = arith.mulf %419, %401 : vector<16x8xf32>
    %421 = arith.addf %420, %402 : vector<16x8xf32>
    %cst_188 = arith.constant dense<0.000000e+00> : vector<8xf32>
    %422 = vector.multi_reduction <add>, %421, %cst_188 [0] : vector<16x8xf32> to vector<8xf32>
    %423 = vector.shape_cast %422 : vector<8xf32> to vector<1x8xf32>
    %cst_189 = arith.constant 1.600000e+01 : f32
    %424 = vector.broadcast %cst_189 : f32 to vector<1x8xf32>
    %425 = arith.divf %423, %424 : vector<1x8xf32>
    %426 = vector.extract_strided_slice %400 {offsets = [16, 0], sizes = [16, 8], strides = [1, 1]} : vector<32x8xf32> to vector<16x8xf32>
    %cst_190 = arith.constant dense<0.000000e+00> : vector<8xf32>
    %427 = vector.multi_reduction <add>, %426, %cst_190 [0] : vector<16x8xf32> to vector<8xf32>
    %428 = vector.shape_cast %427 : vector<8xf32> to vector<1x8xf32>
    %cst_191 = arith.constant 1.600000e+01 : f32
    %429 = vector.broadcast %cst_191 : f32 to vector<1x8xf32>
    %430 = arith.divf %428, %429 : vector<1x8xf32>
    %431 = vector.broadcast %430 : vector<1x8xf32> to vector<16x8xf32>
    %432 = arith.subf %426, %431 : vector<16x8xf32>
    %433 = arith.mulf %432, %432 : vector<16x8xf32>
    %cst_192 = arith.constant dense<0.000000e+00> : vector<8xf32>
    %434 = vector.multi_reduction <add>, %433, %cst_192 [0] : vector<16x8xf32> to vector<8xf32>
    %435 = vector.shape_cast %434 : vector<8xf32> to vector<1x8xf32>
    %cst_193 = arith.constant 1.600000e+01 : f32
    %436 = vector.broadcast %cst_193 : f32 to vector<1x8xf32>
    %437 = arith.divf %435, %436 : vector<1x8xf32>
    %cst_194 = arith.constant 9.99999974E-6 : f32
    %438 = vector.broadcast %cst_194 : f32 to vector<1x8xf32>
    %439 = arith.addf %437, %438 : vector<1x8xf32>
    %440 = math.rsqrt %439 : vector<1x8xf32>
    %441 = vector.broadcast %440 : vector<1x8xf32> to vector<16x8xf32>
    %442 = arith.mulf %432, %441 : vector<16x8xf32>
    %443 = arith.mulf %442, %401 : vector<16x8xf32>
    %444 = arith.addf %443, %402 : vector<16x8xf32>
    %cst_195 = arith.constant dense<0.000000e+00> : vector<8xf32>
    %445 = vector.multi_reduction <add>, %444, %cst_195 [0] : vector<16x8xf32> to vector<8xf32>
    %446 = vector.shape_cast %445 : vector<8xf32> to vector<1x8xf32>
    %cst_196 = arith.constant 1.600000e+01 : f32
    %447 = vector.broadcast %cst_196 : f32 to vector<1x8xf32>
    %448 = arith.divf %446, %447 : vector<1x8xf32>
    %449 = tpu.concatenate %425, %448 in 0 : vector<1x8xf32>, vector<1x8xf32> -> vector<2x8xf32>
    %c0_197 = arith.constant 0 : index
    %c0_198 = arith.constant 0 : index
    %c0_199 = arith.constant 0 : index
    %450 = vector.load %arg16[%c0_197, %c0_198, %c0_199] : memref<1x2x8xf32, #tpu.memory_space<vmem>>, vector<1x2x8xf32>
    %451 = vector.shape_cast %450 : vector<1x2x8xf32> to vector<2x8xf32>
    %452 = vector.shape_cast %449 : vector<2x8xf32> to vector<1x2x8xf32>
    tpu.vector_store %arg16[%c0_197, %c0_198, %c0_199], %452 {strides = array<i32>} : memref<1x2x8xf32, #tpu.memory_space<vmem>>, vector<1x2x8xf32>,
    return
  }
  func.func @transform_0(%arg0: i32) -> (i32, i32, i32) {
    %c0_i32 = arith.constant 0 : i32
    %c0_i32_0 = arith.constant 0 : i32
    %c0_i32_1 = arith.constant 0 : i32
    return %arg0, %c0_i32, %c0_i32_0 : i32, i32, i32
  }
  func.func @transform_1(%arg0: i32) -> (i32, i32) {
    %c0_i32 = arith.constant 0 : i32
    %c0_i32_0 = arith.constant 0 : i32
    %c0_i32_1 = arith.constant 0 : i32
    return %c0_i32, %c0_i32_0 : i32, i32
  }
  func.func @transform_2(%arg0: i32) -> (i32, i32) {
    %c0_i32 = arith.constant 0 : i32
    %c0_i32_0 = arith.constant 0 : i32
    %c0_i32_1 = arith.constant 0 : i32
    return %c0_i32, %c0_i32_0 : i32, i32
  }
  func.func @transform_3(%arg0: i32) -> (i32, i32, i32) {
    %c0_i32 = arith.constant 0 : i32
    %c0_i32_0 = arith.constant 0 : i32
    %c0_i32_1 = arith.constant 0 : i32
    %c0_i32_2 = arith.constant 0 : i32
    return %c0_i32, %c0_i32_0, %c0_i32_1 : i32, i32, i32
  }
  func.func @transform_4(%arg0: i32) -> (i32, i32, i32) {
    %c0_i32 = arith.constant 0 : i32
    %c0_i32_0 = arith.constant 0 : i32
    %c0_i32_1 = arith.constant 0 : i32
    %c0_i32_2 = arith.constant 0 : i32
    return %c0_i32, %c0_i32_0, %c0_i32_1 : i32, i32, i32
  }
  func.func @transform_5(%arg0: i32) -> (i32, i32, i32) {
    %c0_i32 = arith.constant 0 : i32
    %c0_i32_0 = arith.constant 0 : i32
    %c0_i32_1 = arith.constant 0 : i32
    %c0_i32_2 = arith.constant 0 : i32
    return %c0_i32, %c0_i32_0, %c0_i32_1 : i32, i32, i32
  }
  func.func @transform_6(%arg0: i32) -> (i32, i32, i32) {
    %c0_i32 = arith.constant 0 : i32
    %c0_i32_0 = arith.constant 0 : i32
    %c0_i32_1 = arith.constant 0 : i32
    %c0_i32_2 = arith.constant 0 : i32
    return %c0_i32, %c0_i32_0, %c0_i32_1 : i32, i32, i32
  }
  func.func @transform_7(%arg0: i32) -> (i32, i32, i32) {
    %c0_i32 = arith.constant 0 : i32
    %c0_i32_0 = arith.constant 0 : i32
    %c0_i32_1 = arith.constant 0 : i32
    %c0_i32_2 = arith.constant 0 : i32
    return %c0_i32, %c0_i32_0, %c0_i32_1 : i32, i32, i32
  }
  func.func @transform_8(%arg0: i32) -> (i32, i32, i32) {
    %c0_i32 = arith.constant 0 : i32
    %c0_i32_0 = arith.constant 0 : i32
    %c0_i32_1 = arith.constant 0 : i32
    %c0_i32_2 = arith.constant 0 : i32
    return %c0_i32, %c0_i32_0, %c0_i32_1 : i32, i32, i32
  }
  func.func @transform_9(%arg0: i32) -> (i32, i32, i32) {
    %c0_i32 = arith.constant 0 : i32
    %c0_i32_0 = arith.constant 0 : i32
    %c0_i32_1 = arith.constant 0 : i32
    %c0_i32_2 = arith.constant 0 : i32
    return %c0_i32, %c0_i32_0, %c0_i32_1 : i32, i32, i32
  }
  func.func @transform_10(%arg0: i32) -> (i32, i32, i32) {
    %c0_i32 = arith.constant 0 : i32
    %c0_i32_0 = arith.constant 0 : i32
    %c0_i32_1 = arith.constant 0 : i32
    %c0_i32_2 = arith.constant 0 : i32
    return %c0_i32, %c0_i32_0, %c0_i32_1 : i32, i32, i32
  }
  func.func @transform_11(%arg0: i32) -> (i32, i32) {
    %c0_i32 = arith.constant 0 : i32
    %c0_i32_0 = arith.constant 0 : i32
    %c0_i32_1 = arith.constant 0 : i32
    return %c0_i32, %c0_i32_0 : i32, i32
  }
  func.func @transform_12(%arg0: i32) -> (i32, i32) {
    %c0_i32 = arith.constant 0 : i32
    %c0_i32_0 = arith.constant 0 : i32
    %c0_i32_1 = arith.constant 0 : i32
    return %c0_i32, %c0_i32_0 : i32, i32
  }
  func.func @transform_13(%arg0: i32) -> (i32, i32) {
    %c0_i32 = arith.constant 0 : i32
    %c0_i32_0 = arith.constant 0 : i32
    %c0_i32_1 = arith.constant 0 : i32
    return %c0_i32, %c0_i32_0 : i32, i32
  }
  func.func @transform_14(%arg0: i32) -> (i32, i32) {
    %c0_i32 = arith.constant 0 : i32
    %c0_i32_0 = arith.constant 0 : i32
    %c0_i32_1 = arith.constant 0 : i32
    return %c0_i32, %c0_i32_0 : i32, i32
  }
  func.func @transform_15(%arg0: i32) -> (i32, i32, i32) {
    %c0_i32 = arith.constant 0 : i32
    %c0_i32_0 = arith.constant 0 : i32
    %c0_i32_1 = arith.constant 0 : i32
    return %arg0, %c0_i32, %c0_i32_0 : i32, i32, i32
  }
}

</mosaic_0001>

<bundles_post_ra>
// kernel: tpu_custom_call.1
= control target key start
LH: loop header
LB: loop body
LE: loop exit
PB: predicated region body
PF: predicated region fallthrough
CT: control target
= control target key end

     0   :  { %vm63_vm0 = vcmask 64512   ;;  %s3606_s0 = inlined_call_operand.vmem [shape: f32[2,16,8], index: 0, kind: input, shape index: {}]   ;;  %s3607_s1 = inlined_call_operand.vmem [shape: f32[8,8], index: 1, kind: input, shape index: {}]   ;;  %s3608_s2 = inlined_call_operand.vmem [shape: f32[1,8], index: 2, kind: input, shape index: {}]   ;;  %s3609_s3 = inlined_call_operand.vmem [shape: f32[2,8,32], index: 3, kind: input, shape index: {}]   ;;  %s3610_s4 = inlined_call_operand.vmem [shape: f32[2,1,32], index: 4, kind: input, shape index: {}]   ;;  %s3611_s5 = inlined_call_operand.vmem [shape: f32[2,32,8], index: 5, kind: input, shape index: {}]   ;;  %s3612_s6 = inlined_call_operand.vmem [shape: f32[2,1,8], index: 6, kind: input, shape index: {}]   ;;  %s3613_s7 = inlined_call_operand.vmem [shape: f32[2,32,16], index: 7, kind: input, shape index: {}]   ;;  %s3614_s8 = inlined_call_operand.vmem [shape: f32[2,32,8], index: 8, kind: input, shape index: {}]   ;;  %s3615_s9 = inlined_call_operand.vmem [shape: f32[2,16,32], index: 9, kind: input, shape index: {}]   ;;  %s3616_s10 = inlined_call_operand.vmem [shape: f32[2,16,8], index: 10, kind: input, shape index: {}]   ;;  %s3617_s11 = inlined_call_operand.vmem [shape: f32[1,8], index: 11, kind: input, shape index: {}]   ;;  %s3618_s12 = inlined_call_operand.vmem [shape: f32[1,8], index: 12, kind: input, shape index: {}]   ;;  %s3619_s13 = inlined_call_operand.vmem [shape: f32[16,8], index: 13, kind: input, shape index: {}]   ;;  %s3620_s14 = inlined_call_operand.vmem [shape: f32[16,8], index: 14, kind: input, shape index: {}]   ;;  %s3621_s15 = inlined_call_operand.hbm [shape: f32[1,2,8], index: 15, kind: output, shape index: {}]  }
   0x1   :  { %v55_v0 = vld [vmem:[%s3607_s1] sm:$0xff]  ;;  %v52_v2 = vld [vmem:[%s3606_s0 + $0x8] sm:$0xff]  ;;  %v53_v3 = vld [vmem:[%s3606_s0 + $0x10] sm:$0xff] }
   0x2   :  { %v51_v1 = vld [vmem:[%s3606_s0] sm:$0xff]  ;;  %2472 = vmatprep.subr.mxu0 %v55_v0 }
   0x3   :  { %2474 = vmatprep.mubr.msk.f32.mxu0 %vm63_vm0, %v51_v1 }
   0x4   :  { %20 = vsyncpa [#allocation3], 0  ;;  %2473 = vmatpush3.msra.mxu0 %v55_v0  ;;  %v54_v4 = vld [vmem:[%s3606_s0 + $0x18] sm:$0xff]  ;;  %v2323_v5 = vld [vmem:[%s3608_s2] ss:$0 sm:$0xff]  ;;  %vm460_vm4 = vcmask 261120  }
   0x5   :  { %2475 = vmatmul.mubr.msk.f32.vlgmr.msra.gmra.mrb[0].mxu0 %vm63_vm0, %v52_v2  ;;  %v236_v38 = vld [vmem:[%s3609_s3] sm:$0xff]  ;;  %vm634_vm6 = vcmask 130048  }
   0x6   :  { %2477 = vmatprep.mubr.msk.f32.mxu0 %vm63_vm0, %v53_v3  ;;  %2480 = vmatprep.subr.mxu1 %v236_v38  ;;  %v2964_v52 = vld [vmem:[%s3617_s11] ss:$0 sm:$0xff] }
   0x7   :  { %2481 = vmatpush3.msra.mxu1 %v236_v38  ;;  %v2969_v54 = vld [vmem:[%s3618_s12] ss:$0 sm:$0xff] }
   0x9   :  { %2478 = vmatmul.mubr.msk.f32.gmra.mrb[2].mxu0 %vm63_vm0, %v54_v4 }
  0xd8   :  { %v2476_v6 = vpop.f32.mrb[0].mxu0 }
  0xd9   :  { %v142_v7 = vpop.f32.mrb[1].mxu0  ;;  %v2936_v9 = vadd.f32 %v2476_v6, %v2323_v5  ;;  %v450_v6 = vld [vmem:[%s3611_s5 + $0x8] sm:$0xff] }
  0xda   :  { %v2934_v8 = vadd.f32 %v2323_v5, %v142_v7 }
  0xdb   :  { %v166_v16 = vsel %vm63_vm0, %v2936_v9, 0.0 }
  0xdc   :  { %v2479_v10 = vpop.f32.mrb[2].mxu0  ;;  %v163_v11 = vsel %vm63_vm0, %v2934_v8, 0.0 }
  0xdd   :  { %v152_v12 = vpop.f32.mrb[3].mxu0  ;;  %164 = vadd.xlane.f32.xlu0 %v163_v11  ;;  %v2940_v13 = vadd.f32 %v2479_v10, %v2323_v5  ;;  %v451_v10 = vld [vmem:[%s3611_s5 + $0x10] sm:$0xff]  ;;  %v452_v11 = vld [vmem:[%s3611_s5 + $0x18] sm:$0xff] }
  0xde   :  { %v2942_v14 = vadd.f32 %v2323_v5, %v152_v12  ;;  %v449_v5 = vld [vmem:[%s3611_s5] sm:$0xff]  ;;  %v2612_v12 = vpack.c.bf16 %v452_v11, %v451_v10 }
  0xdf   :  { %v172_v17 = vsel %vm63_vm0, %v2940_v13, 0.0  ;;  %v2608_v7 = vpack.c.bf16 %v450_v6, %v449_v5 }
  0xe0   :  { %v169_v15 = vsel %vm63_vm0, %v2942_v14, 0.0 }
  0xe1   :  { %170 = vadd.xlane.f32.xlu1 %v169_v15  ;;  %167 = vadd.xlane.f32.xlu0 %v166_v16  ;;  %v2330_v15 = vld [vmem:[%s3610_s4] ss:$0 sm:$0xff] }
  0xe2   :  { %2609 = vmatprep.subr.bf16.mxu0 %v2608_v7 }
  0xe3   :  { %2611 = vmatpush3.bf16.msra.mxu0 %v2608_v7 }
  0xe4   :  { %2613 = vmatprep.subr.bf16.mxu0 %v2612_v12 }
  0xe5   :  { %173 = vadd.xlane.f32.xlu1 %v172_v17 }
  0xe7   :  { %2615 = vmatpush3.bf16.msra.mxu0 %v2612_v12 }
 0x16a   :  { %v165_v18 = vpop.xlane.xlu0 %164 }
 0x16b   :  { %v176_v19 = vmul.f32 0.125, %v165_v18 }
 0x16d   :  { %v180_v20 = vsub.f32 %v2934_v8, %v176_v19 }
 0x16e   :  { %v171_v21 = vpop.xlane.xlu1 %170  ;;  %v168_v22 = vpop.xlane.xlu0 %167 }
 0x16f   :  { %v178_v23 = vmul.f32 0.125, %v171_v21  ;;  %v177_v24 = vmul.f32 0.125, %v168_v22  ;;  %v184_v25 = vmul.f32 %v180_v20, %v180_v20 }
 0x171   :  { %v182_v26 = vsub.f32 %v2942_v14, %v178_v23  ;;  %v181_v27 = vsub.f32 %v2936_v9, %v177_v24  ;;  %v188_v28 = vsel %vm63_vm0, %v184_v25, 0.0 }
 0x172   :  { %v174_v29 = vpop.xlane.xlu1 %173  ;;  %189 = vadd.xlane.f32.xlu0 %v188_v28 }
 0x173   :  { %v179_v30 = vmul.f32 0.125, %v174_v29  ;;  %v186_v31 = vmul.f32 %v182_v26, %v182_v26  ;;  %v185_v32 = vmul.f32 %v181_v27, %v181_v27 }
 0x175   :  { %v183_v33 = vsub.f32 %v2940_v13, %v179_v30  ;;  %v194_v34 = vsel %vm63_vm0, %v186_v31, 0.0  ;;  %v191_v35 = vsel %vm63_vm0, %v185_v32, 0.0 }
 0x176   :  { %195 = vadd.xlane.f32.xlu0 %v194_v34  ;;  %192 = vadd.xlane.f32.xlu1 %v191_v35 }
 0x177   :  { %v187_v36 = vmul.f32 %v183_v33, %v183_v33 }
 0x179   :  { %v197_v37 = vsel %vm63_vm0, %v187_v36, 0.0 }
 0x17a   :  { %198 = vadd.xlane.f32.xlu1 %v197_v37 }
 0x1ff   :  { %v190_v39 = vpop.xlane.xlu0 %189 }
 0x200   :  { %v200_v40 = vmul.f32 0.125, %v190_v39 }
 0x202   :  { %v204_v41 = vadd.f32 1e-05, %v200_v40 }
 0x203   :  { %v193_v42 = vpop.xlane.xlu1 %192  ;;  %v196_v43 = vpop.xlane.xlu0 %195 }
 0x204   :  { %2673 = vrsqrt.f32 %v204_v41  ;;  %v201_v44 = vmul.f32 0.125, %v193_v42  ;;  %v202_v45 = vmul.f32 0.125, %v196_v43 }
 0x206   :  { %v205_v46 = vadd.f32 1e-05, %v201_v44  ;;  %v206_v47 = vadd.f32 1e-05, %v202_v45 }
 0x207   :  { %v199_v48 = vpop.xlane.xlu1 %198 }
 0x208   :  { %2675 = vrsqrt.f32 %v205_v46  ;;  %v203_v49 = vmul.f32 0.125, %v199_v48 }
 0x209   :  { %2677 = vrsqrt.f32 %v206_v47 }
 0x20a   :  { %v207_v50 = vadd.f32 1e-05, %v203_v49 }
 0x20c   :  { %2679 = vrsqrt.f32 %v207_v50 }
 0x20e   :  { %v2674_v51 = vpop.eup %2673 }
 0x20f   :  { %v212_v53 = vmul.f32 %v2674_v51, %v180_v20 }
 0x211   :  { %v222_v55 = vmul.f32 %v2964_v52, %v212_v53 }
 0x212   :  { %v2676_v56 = vpop.eup %2675 }
 0x213   :  { %v2678_v57 = vpop.eup %2677  ;;  %v232_v58 = vadd.f32 %v2969_v54, %v222_v55  ;;  %v213_v59 = vmul.f32 %v2676_v56, %v181_v27 }
 0x214   :  { %v214_v60 = vmul.f32 %v2678_v57, %v182_v26 }
 0x215   :  { %2482 = vmatprep.mubr.msk.f32.mxu1 %vm63_vm0, %v232_v58  ;;  %v223_v61 = vmul.f32 %v2964_v52, %v213_v59 }
 0x216   :  { %v2680_v62 = vpop.eup %2679  ;;  %v224_v63 = vmul.f32 %v2964_v52, %v214_v60 }
 0x217   :  { %v233_v0 = vadd.f32 %v2969_v54, %v223_v61  ;;  %v215_v1 = vmul.f32 %v2680_v62, %v183_v33 }
 0x218   :  { %v234_v2 = vadd.f32 %v2969_v54, %v224_v63 }
 0x219   :  { %2483 = vmatmul.mubr.msk.f32.vlgmr.msra.gmra.mrb[0].mxu1 %vm63_vm0, %v233_v0  ;;  %v225_v3 = vmul.f32 %v2964_v52, %v215_v1 }
 0x21a   :  { %2485 = vmatprep.mubr.msk.f32.mxu1 %vm63_vm0, %v234_v2 }
 0x21b   :  { %v235_v4 = vadd.f32 %v2969_v54, %v225_v3 }
 0x21d   :  { %2486 = vmatmul.mubr.msk.f32.gmra.mrb[2].mxu1 %vm63_vm0, %v235_v4 }
 0x2ec   :  { %v2484_v16 = vpop.f32.mrb[0].mxu1 }
 0x2ed   :  { %v2998_v17 = vadd.f32 %v2484_v16, %v2330_v15  ;;  %v322_v18 = vpop.f32.mrb[1].mxu1 }
 0x2ee   :  { %v3000_v19 = vadd.f32 %v2330_v15, %v322_v18 }
 0x2ef   :  { %v3003_v20 = vmul.f32 0.70710677, %v2998_v17 }
 0x2f0   :  { %v3006_v21 = vmul.f32 0.70710677, %v3000_v19  ;;  %v2487_v22 = vpop.f32.mrb[2].mxu1 }
 0x2f1   :  { %v350_v23 = vand.u32 2147483647, %v3003_v20  ;;  %v3009_v24 = vadd.f32 %v2487_v22, %v2330_v15  ;;  %v332_v25 = vpop.f32.mrb[3].mxu1  ;;  %vm430_vm1 = vcmp.ge.f32.partialorder %v3003_v20, 0.0 }
 0x2f2   :  { %v349_v26 = vand.u32 2147483647, %v3006_v21  ;;  %v3012_v27 = vadd.f32 %v2330_v15, %v332_v25  ;;  %vm429_vm2 = vcmp.ge.f32.partialorder %v3006_v21, 0.0 }
 0x2f3   :  { %v354_v28 = vmul.f32 0.3275911, %v350_v23  ;;  %v3015_v29 = vmul.f32 0.70710677, %v3009_v24  ;;  %v406_v40 = vsub.f32 0.0, %v350_v23 }
 0x2f4   :  { %v353_v30 = vmul.f32 0.3275911, %v349_v26  ;;  %v3018_v31 = vmul.f32 0.70710677, %v3012_v27  ;;  %v405_v41 = vsub.f32 0.0, %v349_v26 }
 0x2f5   :  { %v358_v32 = vadd.f32 1.0, %v354_v28  ;;  %v352_v33 = vand.u32 2147483647, %v3015_v29  ;;  %v410_v43 = vmul.f32 %v406_v40, %v350_v23  ;;  %vm432_vm3 = vcmp.ge.f32.partialorder %v3015_v29, 0.0 }
 0x2f6   :  { %v357_v34 = vadd.f32 1.0, %v353_v30  ;;  %v351_v35 = vand.u32 2147483647, %v3018_v31  ;;  %v409_v47 = vmul.f32 %v405_v41, %v349_v26  ;;  %vm431_vm5 = vcmp.ge.f32.partialorder %v3018_v31, 0.0  ;;  %v2335_v31 = vld [vmem:[%s3612_s6] ss:$0 sm:$0xff] }
 0x2f7   :  { %2681 = vrcp.f32 %v358_v32  ;;  %v356_v36 = vmul.f32 0.3275911, %v352_v33  ;;  %v408_v44 = vsub.f32 0.0, %v352_v33  ;;  %v415_v53 = vmul.f32 1.442695, %v410_v43 }
 0x2f8   :  { %2683 = vrcp.f32 %v357_v34  ;;  %v355_v37 = vmul.f32 0.3275911, %v351_v35  ;;  %v407_v48 = vsub.f32 0.0, %v351_v35  ;;  %v413_v59 = vmul.f32 1.442695, %v409_v47 }
 0x2f9   :  { %v360_v38 = vadd.f32 1.0, %v356_v36  ;;  %v412_v56 = vmul.f32 %v408_v44, %v352_v33 }
 0x2fa   :  { %v359_v39 = vadd.f32 1.0, %v355_v37  ;;  %v411_v61 = vmul.f32 %v407_v48, %v351_v35 }
 0x2fb   :  { %2685 = vrcp.f32 %v360_v38  ;;  %v419_v3 = vmul.f32 1.442695, %v412_v56 }
 0x2fc   :  { %2687 = vrcp.f32 %v359_v39  ;;  %v417_v7 = vmul.f32 1.442695, %v411_v61 }
 0x2fd   :  { %2689 = vpow2.f32 %v415_v53 }
 0x2fe   :  { %2691 = vpow2.f32 %v413_v59 }
 0x2ff   :  { %2693 = vpow2.f32 %v419_v3 }
 0x300   :  { %2695 = vpow2.f32 %v417_v7 }
 0x301   :  { %v2682_v42 = vpop.eup %2681 }
 0x302   :  { %v2684_v45 = vpop.eup %2683  ;;  %v370_v46 = vmul.f32 1.0614054, %v2682_v42 }
 0x303   :  { %v369_v49 = vmul.f32 1.0614054, %v2684_v45 }
 0x304   :  { %v374_v50 = vadd.f32 -1.4531521, %v370_v46 }
 0x305   :  { %v2686_v51 = vpop.eup %2685  ;;  %v373_v55 = vadd.f32 -1.4531521, %v369_v49 }
 0x306   :  { %v2688_v57 = vpop.eup %2687  ;;  %v378_v58 = vmul.f32 %v2682_v42, %v374_v50  ;;  %v372_v60 = vmul.f32 1.0614054, %v2686_v51 }
 0x307   :  { %v377_v62 = vmul.f32 %v2684_v45, %v373_v55  ;;  %v371_v63 = vmul.f32 1.0614054, %v2688_v57  ;;  %v2690_v36 = vpop.eup %2689 }
 0x308   :  { %v382_v0 = vadd.f32 1.4214138, %v378_v58  ;;  %v376_v1 = vadd.f32 -1.4531521, %v372_v60  ;;  %v2692_v39 = vpop.eup %2691 }
 0x309   :  { %v381_v2 = vadd.f32 1.4214138, %v377_v62  ;;  %v375_v4 = vadd.f32 -1.4531521, %v371_v63  ;;  %v2694_v48 = vpop.eup %2693  ;;  %v341_v63 = vmul.f32 0.5, %v3000_v19  ;;  %v344_v19 = vmul.f32 0.5, %v3009_v24 }
 0x30a   :  { %v386_v5 = vmul.f32 %v2682_v42, %v382_v0  ;;  %v380_v6 = vmul.f32 %v2686_v51, %v376_v1  ;;  %v2696_v53 = vpop.eup %2695 }
 0x30b   :  { %v385_v10 = vmul.f32 %v2684_v45, %v381_v2  ;;  %v379_v11 = vmul.f32 %v2688_v57, %v375_v4 }
 0x30c   :  { %v390_v12 = vadd.f32 -0.28449672, %v386_v5  ;;  %v384_v15 = vadd.f32 1.4214138, %v380_v6  ;;  %v343_v5 = vmul.f32 0.5, %v3012_v27 }
 0x30d   :  { %v389_v16 = vadd.f32 -0.28449672, %v385_v10  ;;  %v383_v18 = vadd.f32 1.4214138, %v379_v11 }
 0x30e   :  { %v394_v22 = vmul.f32 %v2682_v42, %v390_v12  ;;  %v388_v23 = vmul.f32 %v2686_v51, %v384_v15 }
 0x30f   :  { %v393_v25 = vmul.f32 %v2684_v45, %v389_v16  ;;  %v387_v26 = vmul.f32 %v2688_v57, %v383_v18 }
 0x310   :  { %v398_v28 = vadd.f32 0.2548296, %v394_v22  ;;  %v392_v30 = vadd.f32 -0.28449672, %v388_v23 }
 0x311   :  { %v397_v32 = vadd.f32 0.2548296, %v393_v25  ;;  %v391_v33 = vadd.f32 -0.28449672, %v387_v26 }
 0x312   :  { %v402_v34 = vmul.f32 %v2682_v42, %v398_v28  ;;  %v396_v35 = vmul.f32 %v2686_v51, %v392_v30 }
 0x313   :  { %v401_v37 = vmul.f32 %v2684_v45, %v397_v32  ;;  %v395_v38 = vmul.f32 %v2688_v57, %v391_v33 }
 0x314   :  { %v422_v40 = vmul.f32 %v2690_v36, %v402_v34  ;;  %v400_v41 = vadd.f32 0.2548296, %v396_v35 }
 0x315   :  { %v421_v43 = vmul.f32 %v2692_v39, %v401_v37  ;;  %v399_v44 = vadd.f32 0.2548296, %v395_v38 }
 0x316   :  { %v426_v46 = vsub.f32 1.0, %v422_v40  ;;  %v404_v47 = vmul.f32 %v2686_v51, %v400_v41 }
 0x317   :  { %v425_v49 = vsub.f32 1.0, %v421_v43  ;;  %v403_v50 = vmul.f32 %v2688_v57, %v399_v44  ;;  %v342_v57 = vmul.f32 0.5, %v2998_v17 }
 0x318   :  { %v434_v55 = vsub.f32 0.0, %v426_v46  ;;  %v424_v56 = vmul.f32 %v2694_v48, %v404_v47 }
 0x319   :  { %v433_v42 = vsub.f32 0.0, %v425_v49  ;;  %v423_v58 = vmul.f32 %v2696_v53, %v403_v50  ;;  %v622_v53 = vld [vmem:[%s3613_s7] sm:$0xff] }
 0x31a   :  { %v438_v59 = vsel %vm430_vm1, %v426_v46, %v434_v55  ;;  %v428_v45 = vsub.f32 1.0, %v424_v56  ;;  %2506 = vmatprep.mubr.msk.f32.mxu1 %vm634_vm6, %v622_v53 }
 0x31b   :  { %v442_v60 = vadd.f32 1.0, %v438_v59  ;;  %v437_v61 = vsel %vm429_vm2, %v425_v49, %v433_v42  ;;  %v427_v62 = vsub.f32 1.0, %v423_v58 }
 0x31c   :  { %v441_v51 = vadd.f32 1.0, %v437_v61  ;;  %v436_v0 = vsub.f32 0.0, %v428_v45 }
 0x31d   :  { %v435_v1 = vsub.f32 0.0, %v427_v62  ;;  %v446_v3 = vmul.f32 %v442_v60, %v342_v57 }
 0x31e   :  { %v445_v20 = vmul.f32 %v441_v51, %v341_v63  ;;  %v440_v2 = vsel %vm432_vm3, %v428_v45, %v436_v0 }
 0x31f   :  { %v444_v21 = vadd.f32 1.0, %v440_v2  ;;  %v439_v4 = vsel %vm431_vm5, %v427_v62, %v435_v1 }
 0x320   :  { %v443_v6 = vadd.f32 1.0, %v439_v4  ;;  %2496 = vmatprep.mubr.msk.f32.mxu0 %vm460_vm4, %v445_v20 }
 0x321   :  { %2497 = vmatmul.mubr.msk.f32.vlgmr.msra.gmra.mrb[4].mxu0 %vm460_vm4, %v446_v3  ;;  %v448_v29 = vmul.f32 %v444_v21, %v344_v19 }
 0x322   :  { %v447_v17 = vmul.f32 %v443_v6, %v343_v5 }
 0x324   :  { %2499 = vmatprep.mubr.msk.f32.mxu0 %vm460_vm4, %v447_v17 }
 0x325   :  { %2500 = vmatmul.mubr.msk.f32.gmra.mrb[6].mxu0 %vm460_vm4, %v448_v29 }
 0x3f4   :  { %v2498_v7 = vpop.f32.mrb[4].mxu0 }
 0x3f5   :  { %v545_v10 = vadd.f32 %v2498_v7, %v2335_v31  ;;  %v539_v27 = vpop.f32.mrb[5].mxu0 }
 0x3f6   :  { %v540_v11 = vadd.f32 %v2335_v31, %v539_v27 }
 0x3f7   :  { %v559_v12 = vadd.f32 %v545_v10, %v2936_v9 }
 0x3f8   :  { %v2501_v15 = vpop.f32.mrb[6].mxu0  ;;  %v558_v24 = vadd.f32 %v540_v11, %v2934_v8 }
 0x3f9   :  { %v555_v16 = vadd.f32 %v2501_v15, %v2335_v31  ;;  %v549_v18 = vpop.f32.mrb[7].mxu0  ;;  %v565_v22 = vsel %vm63_vm0, %v559_v12, 0.0 }
 0x3fa   :  { %v550_v23 = vadd.f32 %v2335_v31, %v549_v18  ;;  %566 = vadd.xlane.f32.xlu1 %v565_v22  ;;  %v562_v25 = vsel %vm63_vm0, %v558_v24, 0.0  ;;  %v626_v18 = vld [vmem:[%s3614_s8] sm:$0xff] }
 0x3fb   :  { %563 = vadd.xlane.f32.xlu0 %v562_v25  ;;  %v561_v26 = vadd.f32 %v555_v16, %v2940_v13  ;;  %v627_v16 = vld [vmem:[%s3614_s8 + $0x8] sm:$0xff] }
 0x3fc   :  { %v560_v28 = vadd.f32 %v550_v23, %v2942_v14 }
 0x3fd   :  { %v571_v30 = vsel %vm63_vm0, %v561_v26, 0.0 }
 0x3fe   :  { %572 = vadd.xlane.f32.xlu1 %v571_v30  ;;  %v568_v9 = vsel %vm63_vm0, %v560_v28, 0.0 }
 0x3ff   :  { %569 = vadd.xlane.f32.xlu0 %v568_v9  ;;  %v628_v9 = vld [vmem:[%s3614_s8 + $0x10] sm:$0xff] }
 0x487   :  { %v567_v8 = vpop.xlane.xlu1 %566 }
 0x488   :  { %v575_v32 = vmul.f32 0.125, %v567_v8  ;;  %v564_v33 = vpop.xlane.xlu0 %563 }
 0x489   :  { %v574_v34 = vmul.f32 0.125, %v564_v33 }
 0x48a   :  { %v579_v35 = vsub.f32 %v559_v12, %v575_v32  ;;  %v623_v12 = vld [vmem:[%s3613_s7 + $0x8] sm:$0xff] }
 0x48b   :  { %v578_v36 = vsub.f32 %v558_v24, %v574_v34  ;;  %v573_v37 = vpop.xlane.xlu1 %572  ;;  %v624_v24 = vld [vmem:[%s3613_s7 + $0x10] sm:$0xff] }
 0x48c   :  { %v577_v38 = vmul.f32 0.125, %v573_v37  ;;  %v570_v39 = vpop.xlane.xlu0 %569  ;;  %v583_v40 = vmul.f32 %v579_v35, %v579_v35 }
 0x48d   :  { %v576_v41 = vmul.f32 0.125, %v570_v39  ;;  %v582_v13 = vmul.f32 %v578_v36, %v578_v36 }
 0x48e   :  { %v581_v43 = vsub.f32 %v561_v26, %v577_v38  ;;  %v589_v14 = vsel %vm63_vm0, %v583_v40, 0.0 }
 0x48f   :  { %v580_v44 = vsub.f32 %v560_v28, %v576_v41  ;;  %590 = vadd.xlane.f32.xlu1 %v589_v14  ;;  %v586_v46 = vsel %vm63_vm0, %v582_v13, 0.0  ;;  %v629_v28 = vld [vmem:[%s3614_s8 + $0x18] sm:$0xff] }
 0x490   :  { %587 = vadd.xlane.f32.xlu0 %v586_v46  ;;  %v585_v47 = vmul.f32 %v581_v43, %v581_v43 }
 0x491   :  { %v584_v48 = vmul.f32 %v580_v44, %v580_v44 }
 0x492   :  { %v595_v49 = vsel %vm63_vm0, %v585_v47, 0.0 }
 0x493   :  { %596 = vadd.xlane.f32.xlu1 %v595_v49  ;;  %v592_v50 = vsel %vm63_vm0, %v584_v48, 0.0 }
 0x494   :  { %593 = vadd.xlane.f32.xlu0 %v592_v50 }
 0x51c   :  { %v591_v55 = vpop.xlane.xlu1 %590 }
 0x51d   :  { %v599_v56 = vmul.f32 0.125, %v591_v55  ;;  %v588_v42 = vpop.xlane.xlu0 %587 }
 0x51e   :  { %v598_v58 = vmul.f32 0.125, %v588_v42 }
 0x51f   :  { %v603_v59 = vadd.f32 1e-05, %v599_v56 }
 0x520   :  { %v602_v45 = vadd.f32 1e-05, %v598_v58  ;;  %v597_v60 = vpop.xlane.xlu1 %596 }
 0x521   :  { %2697 = vrsqrt.f32 %v603_v59  ;;  %v601_v61 = vmul.f32 0.125, %v597_v60  ;;  %v594_v62 = vpop.xlane.xlu0 %593 }
 0x522   :  { %2699 = vrsqrt.f32 %v602_v45  ;;  %v600_v63 = vmul.f32 0.125, %v594_v62 }
 0x523   :  { %v605_v51 = vadd.f32 1e-05, %v601_v61 }
 0x524   :  { %v604_v0 = vadd.f32 1e-05, %v600_v63 }
 0x525   :  { %2701 = vrsqrt.f32 %v605_v51 }
 0x526   :  { %2703 = vrsqrt.f32 %v604_v0 }
 0x52b   :  { %v2698_v57 = vpop.eup %2697 }
 0x52c   :  { %v2700_v1 = vpop.eup %2699  ;;  %v611_v20 = vmul.f32 %v2698_v57, %v579_v35 }
 0x52d   :  { %v610_v2 = vmul.f32 %v2700_v1, %v578_v36 }
 0x52e   :  { %v615_v3 = vmul.f32 %v2964_v52, %v611_v20 }
 0x52f   :  { %v2702_v21 = vpop.eup %2701  ;;  %v614_v4 = vmul.f32 %v2964_v52, %v610_v2 }
 0x530   :  { %v2704_v5 = vpop.eup %2703  ;;  %v3056_v6 = vadd.f32 %v2969_v54, %v615_v3  ;;  %v613_v19 = vmul.f32 %v2702_v21, %v581_v43 }
 0x531   :  { %v3059_v17 = vadd.f32 %v2969_v54, %v614_v4  ;;  %v612_v29 = vmul.f32 %v2704_v5, %v580_v44 }
 0x532   :  { %v617_v31 = vmul.f32 %v2964_v52, %v613_v19 }
 0x533   :  { %v2616_v7 = vpack.c.bf16 %v3056_v6, %v3059_v17  ;;  %v616_v10 = vmul.f32 %v2964_v52, %v612_v29  ;;  %v625_v52 = vld [vmem:[%s3613_s7 + $0x18] sm:$0xff] }
 0x534   :  { %v3066_v27 = vadd.f32 %v2969_v54, %v617_v31 }
 0x535   :  { %2617 = vmatprep.subr.bf16.mxu1 %v2616_v7  ;;  %v3069_v11 = vadd.f32 %v2969_v54, %v616_v10  ;;  %v3092_v54 = vld [vmem:[%s3615_s9] sm:$0xff] }
 0x536   :  { %2619 = vmatpush3.bf16.msra.mxu1 %v2616_v7  ;;  %2520 = vmatprep.mubr.msk.f32.mxu0 %vm460_vm4, %v3092_v54 }
 0x537   :  { %v2628_v15 = vpack.c.bf16 %v3066_v27, %v3069_v11 }
 0x539   :  { %2507 = vmatmul.mubr.msk.f32.vlgmr.msra.gmra.mrb[4].mxu1 %vm634_vm6, %v623_v12  ;;  %2629 = vmatprep.subr.bf16.mxu1 %v2628_v15 }
 0x53a   :  { %2631 = vmatpush3.bf16.msra.mxu1 %v2628_v15  ;;  %2509 = vmatprep.mubr.msk.f32.mxu1 %vm634_vm6, %v624_v24 }
 0x53d   :  { %2510 = vmatmul.mubr.msk.f32.gmra.mrb[6].mxu1 %vm634_vm6, %v625_v52 }
 0x53e   :  { %2527 = vmatprep.mubr.msk.f32.mxu1 %vm634_vm6, %v622_v53 }
 0x541   :  { %2528 = vmatmul.mubr.msk.f32.vlgmr.msra.gmra.mrb[8].mxu1 %vm634_vm6, %v623_v12 }
 0x542   :  { %2530 = vmatprep.mubr.msk.f32.mxu1 %vm634_vm6, %v624_v24 }
 0x545   :  { %2531 = vmatmul.mubr.msk.f32.gmra.mrb[10].mxu1 %vm634_vm6, %v625_v52 }
 0x60c   :  { %v2508_v22 = vpop.f32.mrb[4].mxu1 }
 0x60d   :  { %v719_v23 = vadd.f32 %v2508_v22, %v627_v16  ;;  %v713_v25 = vpop.f32.mrb[5].mxu1 }
 0x60e   :  { %v714_v26 = vadd.f32 %v713_v25, %v626_v18 }
 0x60f   :  { %v3105_v30 = vmul.f32 0.70710677, %v719_v23  ;;  %v3136_v20 = vmul.f32 0.5, %v719_v23 }
 0x610   :  { %v3110_v8 = vmul.f32 0.70710677, %v714_v26  ;;  %v2511_v32 = vpop.f32.mrb[6].mxu1  ;;  %v3138_v2 = vmul.f32 0.5, %v714_v26 }
 0x611   :  { %v741_v33 = vand.u32 2147483647, %v3105_v30  ;;  %v729_v34 = vadd.f32 %v2511_v32, %v629_v28  ;;  %v723_v35 = vpop.f32.mrb[7].mxu1  ;;  %vm821_vm7 = vcmp.ge.f32.partialorder %v3105_v30, 0.0 }
 0x612   :  { %v740_v36 = vand.u32 2147483647, %v3110_v8  ;;  %v3114_v37 = vadd.f32 %v723_v35, %v628_v9  ;;  %vm820_vm8 = vcmp.ge.f32.partialorder %v3110_v8, 0.0 }
 0x613   :  { %v745_v38 = vmul.f32 0.3275911, %v741_v33  ;;  %v3116_v39 = vmul.f32 0.70710677, %v729_v34  ;;  %v797_v49 = vsub.f32 0.0, %v741_v33  ;;  %v3143_v4 = vmul.f32 0.5, %v729_v34 }
 0x614   :  { %v744_v40 = vmul.f32 0.3275911, %v740_v36  ;;  %v3119_v41 = vmul.f32 0.70710677, %v3114_v37  ;;  %v2529_v14 = vpop.f32.mrb[8].mxu1  ;;  %v796_v55 = vsub.f32 0.0, %v740_v36 }
 0x615   :  { %v749_v13 = vadd.f32 1.0, %v745_v38  ;;  %v743_v43 = vand.u32 2147483647, %v3116_v39  ;;  %v989_v47 = vpop.f32.mrb[9].mxu1  ;;  %v3123_v42 = vadd.f32 %v2529_v14, %v627_v16  ;;  %v801_v62 = vmul.f32 %v797_v49, %v741_v33 }
 0x616   :  { %v748_v44 = vadd.f32 1.0, %v744_v40  ;;  %v742_v46 = vand.u32 2147483647, %v3119_v41  ;;  %v3125_v45 = vadd.f32 %v989_v47, %v626_v18  ;;  %v800_v51 = vmul.f32 %v796_v55, %v740_v36 }
 0x617   :  { %2705 = vrcp.f32 %v749_v13  ;;  %v747_v48 = vmul.f32 0.3275911, %v743_v43  ;;  %v799_v60 = vsub.f32 0.0, %v743_v43  ;;  %v3128_v61 = vmul.f32 0.70710677, %v3123_v42 }
 0x618   :  { %2707 = vrcp.f32 %v748_v44  ;;  %v746_v50 = vmul.f32 0.3275911, %v742_v46  ;;  %v2532_v53 = vpop.f32.mrb[10].mxu1  ;;  %v3131_v63 = vmul.f32 0.70710677, %v3125_v45  ;;  %v798_v0 = vsub.f32 0.0, %v742_v46 }
 0x619   :  { %v751_v56 = vadd.f32 1.0, %v747_v48  ;;  %v999_v58 = vpop.f32.mrb[11].mxu1  ;;  %v1017_v57 = vand.u32 2147483647, %v3128_v61  ;;  %v3134_v1 = vadd.f32 %v2532_v53, %v629_v28  ;;  %v803_v5 = vmul.f32 %v799_v60, %v743_v43 }
 0x61a   :  { %v750_v59 = vadd.f32 1.0, %v746_v50  ;;  %v1016_v3 = vand.u32 2147483647, %v3131_v63  ;;  %v3141_v21 = vadd.f32 %v999_v58, %v628_v9  ;;  %v806_v31 = vmul.f32 1.442695, %v801_v62 }
 0x61b   :  { %2709 = vrcp.f32 %v751_v56  ;;  %v1021_v19 = vmul.f32 0.3275911, %v1017_v57  ;;  %v3146_v29 = vmul.f32 0.70710677, %v3134_v1  ;;  %v804_v15 = vmul.f32 1.442695, %v800_v51 }
 0x61c   :  { %2711 = vrcp.f32 %v750_v59  ;;  %v1020_v7 = vmul.f32 0.3275911, %v1016_v3  ;;  %v3149_v10 = vmul.f32 0.70710677, %v3141_v21  ;;  %v802_v24 = vmul.f32 %v798_v0, %v742_v46 }
 0x61d   :  { %v1025_v52 = vadd.f32 1.0, %v1021_v19  ;;  %v1019_v16 = vand.u32 2147483647, %v3146_v29  ;;  %v1073_v23 = vsub.f32 0.0, %v1017_v57  ;;  %v810_v9 = vmul.f32 1.442695, %v803_v5 }
 0x61e   :  { %v1024_v25 = vadd.f32 1.0, %v1020_v7  ;;  %v1018_v26 = vand.u32 2147483647, %v3149_v10  ;;  %v1072_v34 = vsub.f32 0.0, %v1016_v3  ;;  %v808_v46 = vmul.f32 1.442695, %v802_v24 }
 0x61f   :  { %2713 = vrcp.f32 %v1025_v52  ;;  %v1023_v32 = vmul.f32 0.3275911, %v1019_v16  ;;  %v1075_v35 = vsub.f32 0.0, %v1019_v16  ;;  %v1077_v47 = vmul.f32 %v1073_v23, %v1017_v57 }
 0x620   :  { %2715 = vrcp.f32 %v1024_v25  ;;  %v1022_v13 = vmul.f32 0.3275911, %v1018_v26  ;;  %v1076_v56 = vmul.f32 %v1072_v34, %v1016_v3  ;;  %v1074_v62 = vsub.f32 0.0, %v1018_v26 }
 0x621   :  { %v3151_v12 = vpop.eup %2705  ;;  %2717 = vpow2.f32 %v806_v31  ;;  %v1027_v40 = vadd.f32 1.0, %v1023_v32  ;;  %v1079_v58 = vmul.f32 %v1075_v35, %v1019_v16  ;;  %v1082_v57 = vmul.f32 1.442695, %v1077_v47 }
 0x622   :  { %v3154_v18 = vpop.eup %2707  ;;  %v761_v22 = vmul.f32 1.0614054, %v3151_v12  ;;  %v1026_v50 = vadd.f32 1.0, %v1022_v13  ;;  %v3171_v19 = vmul.f32 0.5, %v3114_v37  ;;  %v1078_v7 = vmul.f32 %v1074_v62, %v1018_v26 }
 0x623   :  { %v760_v28 = vmul.f32 1.0614054, %v3154_v18  ;;  %2719 = vrcp.f32 %v1027_v40  ;;  %v1080_v52 = vmul.f32 1.442695, %v1076_v56  ;;  %vm823_vm9 = vcmp.ge.f32.partialorder %v3116_v39, 0.0 }
 0x624   :  { %v765_v33 = vadd.f32 -1.4531521, %v761_v22  ;;  %2721 = vrcp.f32 %v1026_v50  ;;  %v1084_v35 = vmul.f32 1.442695, %v1078_v7  ;;  %vm822_vm10 = vcmp.ge.f32.partialorder %v3119_v41, 0.0 }
 0x625   :  { %v3159_v36 = vpop.eup %2709  ;;  %v764_v38 = vadd.f32 -1.4531521, %v760_v28  ;;  %2723 = vpow2.f32 %v804_v15  ;;  %v1086_v15 = vmul.f32 1.442695, %v1079_v58  ;;  %vm1097_vm11 = vcmp.ge.f32.partialorder %v3128_v61, 0.0 }
 0x626   :  { %v3161_v43 = vpop.eup %2711  ;;  %v769_v14 = vmul.f32 %v3151_v12, %v765_v33  ;;  %v763_v44 = vmul.f32 1.0614054, %v3159_v36  ;;  %2725 = vpow2.f32 %v810_v9  ;;  %vm1096_vm12 = vcmp.ge.f32.partialorder %v3131_v63, 0.0 }
 0x627   :  { %v768_v48 = vmul.f32 %v3154_v18, %v764_v38  ;;  %v762_v49 = vmul.f32 1.0614054, %v3161_v43  ;;  %2727 = vpow2.f32 %v808_v46  ;;  %v1008_v61 = vmul.f32 0.5, %v3125_v45 }
 0x628   :  { %v773_v53 = vadd.f32 1.4214138, %v769_v14  ;;  %v767_v55 = vadd.f32 -1.4531521, %v763_v44  ;;  %2729 = vpow2.f32 %v1082_v57  ;;  %vm1099_vm13 = vcmp.ge.f32.partialorder %v3146_v29, 0.0 }
 0x629   :  { %v772_v59 = vadd.f32 1.4214138, %v768_v48  ;;  %v766_v60 = vadd.f32 -1.4531521, %v762_v49  ;;  %v3174_v16 = vpop.eup %2713  ;;  %2731 = vpow2.f32 %v1080_v52  ;;  %vm1098_vm14 = vcmp.ge.f32.partialorder %v3149_v10, 0.0 }
 0x62a   :  { %v777_v51 = vmul.f32 %v3151_v12, %v773_v53  ;;  %v771_v0 = vmul.f32 %v3159_v36, %v767_v55  ;;  %v3176_v25 = vpop.eup %2715  ;;  %v1037_v32 = vmul.f32 1.0614054, %v3174_v16  ;;  %2733 = vpow2.f32 %v1086_v15 }
 0x62b   :  { %v776_v5 = vmul.f32 %v3154_v18, %v772_v59  ;;  %v770_v31 = vmul.f32 %v3161_v43, %v766_v60  ;;  %v2718_v26 = vpop.eup %2717  ;;  %v1036_v34 = vmul.f32 1.0614054, %v3176_v25  ;;  %2735 = vpow2.f32 %v1084_v35 }
 0x62c   :  { %v781_v3 = vadd.f32 -0.28449672, %v777_v51  ;;  %v775_v24 = vadd.f32 1.4214138, %v771_v0  ;;  %v1041_v13 = vadd.f32 -1.4531521, %v1037_v32 }
 0x62d   :  { %v780_v22 = vadd.f32 -0.28449672, %v776_v5  ;;  %v774_v23 = vadd.f32 1.4214138, %v770_v31  ;;  %v3184_v14 = vpop.eup %2719  ;;  %v1040_v47 = vadd.f32 -1.4531521, %v1036_v34 }
 0x62e   :  { %v785_v28 = vmul.f32 %v3151_v12, %v781_v3  ;;  %v779_v37 = vmul.f32 %v3159_v36, %v775_v24  ;;  %v1045_v50 = vmul.f32 %v3174_v16, %v1041_v13  ;;  %v1039_v53 = vmul.f32 1.0614054, %v3184_v14  ;;  %v3192_v55 = vpop.eup %2721 }
 0x62f   :  { %v784_v33 = vmul.f32 %v3154_v18, %v780_v22  ;;  %v778_v9 = vmul.f32 %v3161_v43, %v774_v23  ;;  %v1044_v59 = vmul.f32 %v3176_v25, %v1040_v47  ;;  %v2724_v60 = vpop.eup %2723  ;;  %v1038_v7 = vmul.f32 1.0614054, %v3192_v55 }
 0x630   :  { %v789_v38 = vadd.f32 0.2548296, %v785_v28  ;;  %v783_v40 = vadd.f32 -0.28449672, %v779_v37  ;;  %v1049_v51 = vadd.f32 1.4214138, %v1045_v50  ;;  %v2726_v3 = vpop.eup %2725 }
 0x631   :  { %v788_v44 = vadd.f32 0.2548296, %v784_v33  ;;  %v782_v46 = vadd.f32 -0.28449672, %v778_v9  ;;  %v1043_v0 = vadd.f32 -1.4531521, %v1039_v53  ;;  %v2728_v23 = vpop.eup %2727 }
 0x632   :  { %v793_v48 = vmul.f32 %v3151_v12, %v789_v38  ;;  %v787_v49 = vmul.f32 %v3159_v36, %v783_v40  ;;  %v1048_v31 = vadd.f32 1.4214138, %v1044_v59  ;;  %v1053_v52 = vmul.f32 %v3174_v16, %v1049_v51 }
 0x633   :  { %v792_v56 = vmul.f32 %v3154_v18, %v788_v44  ;;  %v786_v58 = vmul.f32 %v3161_v43, %v782_v46  ;;  %v1047_v22 = vmul.f32 %v3184_v14, %v1043_v0  ;;  %v1042_v32 = vadd.f32 -1.4531521, %v1038_v7 }
 0x634   :  { %v813_v62 = vmul.f32 %v2718_v26, %v793_v48  ;;  %v791_v12 = vadd.f32 0.2548296, %v787_v49  ;;  %v1052_v37 = vmul.f32 %v3176_v25, %v1048_v31  ;;  %v2730_v26 = vpop.eup %2729  ;;  %v1057_v34 = vadd.f32 -0.28449672, %v1053_v52 }
 0x635   :  { %v812_v57 = vmul.f32 %v2724_v60, %v792_v56  ;;  %v790_v5 = vadd.f32 0.2548296, %v786_v58  ;;  %v1051_v35 = vadd.f32 1.4214138, %v1047_v22  ;;  %v1046_v13 = vmul.f32 %v3192_v55, %v1042_v32  ;;  %v2732_v44 = vpop.eup %2731 }
 0x636   :  { %v817_v24 = vsub.f32 1.0, %v813_v62  ;;  %v795_v18 = vmul.f32 %v3159_v36, %v791_v12  ;;  %v1056_v40 = vadd.f32 -0.28449672, %v1052_v37  ;;  %v2734_v49 = vpop.eup %2733 }
 0x637   :  { %v816_v15 = vsub.f32 1.0, %v812_v57  ;;  %v794_v28 = vmul.f32 %v3161_v43, %v790_v5  ;;  %v1061_v43 = vmul.f32 %v3174_v16, %v1057_v34  ;;  %v1055_v48 = vmul.f32 %v3184_v14, %v1051_v35  ;;  %v2736_v51 = vpop.eup %2735 }
 0x638   :  { %v825_v33 = vsub.f32 0.0, %v817_v24  ;;  %v815_v9 = vmul.f32 %v2726_v3, %v795_v18  ;;  %v1060_v58 = vmul.f32 %v3176_v25, %v1056_v40  ;;  %v1050_v5 = vadd.f32 1.4214138, %v1046_v13 }
 0x639   :  { %v824_v38 = vsub.f32 0.0, %v816_v15  ;;  %v814_v36 = vmul.f32 %v2728_v23, %v794_v28  ;;  %v1065_v62 = vadd.f32 0.2548296, %v1061_v43  ;;  %v1059_v12 = vadd.f32 -0.28449672, %v1055_v48 }
 0x63a   :  { %v829_v46 = vsel %vm821_vm7, %v817_v24, %v825_v33  ;;  %v819_v47 = vsub.f32 1.0, %v815_v9  ;;  %v1064_v57 = vadd.f32 0.2548296, %v1060_v58  ;;  %v1010_v58 = vmul.f32 0.5, %v3141_v21 }
 0x63b   :  { %v833_v50 = vadd.f32 1.0, %v829_v46  ;;  %v828_v53 = vsel %vm820_vm8, %v816_v15, %v824_v38  ;;  %v818_v56 = vsub.f32 1.0, %v814_v36  ;;  %v1069_v8 = vmul.f32 %v3174_v16, %v1065_v62 }
 0x63c   :  { %v832_v59 = vadd.f32 1.0, %v828_v53  ;;  %v827_v60 = vsub.f32 0.0, %v819_v47  ;;  %v1063_v3 = vmul.f32 %v3184_v14, %v1059_v12  ;;  %v1068_v52 = vmul.f32 %v3176_v25, %v1064_v57 }
 0x63d   :  { %v837_v30 = vmul.f32 %v833_v50, %v3136_v20  ;;  %v826_v0 = vsub.f32 0.0, %v818_v56  ;;  %v1054_v20 = vmul.f32 %v3192_v55, %v1050_v5  ;;  %v1089_v23 = vmul.f32 %v2730_v26, %v1069_v8 }
 0x63e   :  { %v836_v31 = vmul.f32 %v832_v59, %v3138_v2  ;;  %v831_v7 = vsel %vm823_vm9, %v819_v47, %v827_v60  ;;  %v1067_v15 = vadd.f32 0.2548296, %v1063_v3  ;;  %v1088_v39 = vmul.f32 %v2732_v44, %v1068_v52  ;;  %v631_v44 = vld [vmem:[%s3615_s9 + $0x8] sm:$0xff] }
 0x63f   :  { %v835_v24 = vadd.f32 1.0, %v831_v7  ;;  %v830_v18 = vsel %vm822_vm10, %v818_v56, %v826_v0  ;;  %v1058_v37 = vadd.f32 -0.28449672, %v1054_v20  ;;  %v1093_v32 = vsub.f32 1.0, %v1089_v23 }
 0x640   :  { %v834_v22 = vadd.f32 1.0, %v830_v18  ;;  %v2620_v28 = vpack.c.bf16 %v837_v30, %v836_v31  ;;  %v1071_v33 = vmul.f32 %v3184_v14, %v1067_v15  ;;  %v1092_v41 = vsub.f32 1.0, %v1088_v39 }
 0x641   :  { %v839_v2 = vmul.f32 %v835_v24, %v3143_v4  ;;  %v1062_v9 = vmul.f32 %v3192_v55, %v1058_v37  ;;  %v1101_v25 = vsub.f32 0.0, %v1093_v32  ;;  %v1011_v56 = vmul.f32 0.5, %v3134_v1  ;;  %v632_v1 = vld [vmem:[%s3616_s10] sm:$0xff] }
 0x642   :  { %v838_v16 = vmul.f32 %v834_v22, %v3171_v19  ;;  %2621 = vmatprep.subr.bf16.mxu0 %v2620_v28  ;;  %v1091_v34 = vmul.f32 %v2734_v49, %v1071_v33  ;;  %v1100_v26 = vsub.f32 0.0, %v1092_v41  ;;  %v1009_v19 = vmul.f32 0.5, %v3123_v42 }
 0x643   :  { %2623 = vmatpush3.bf16.msra.mxu0 %v2620_v28  ;;  %v1066_v38 = vadd.f32 0.2548296, %v1062_v9  ;;  %v1105_v4 = vsel %vm1097_vm11, %v1093_v32, %v1101_v25 }
 0x644   :  { %v2624_v35 = vpack.c.bf16 %v839_v2, %v838_v16  ;;  %v1095_v36 = vsub.f32 1.0, %v1091_v34  ;;  %v1109_v14 = vadd.f32 1.0, %v1105_v4  ;;  %v1104_v40 = vsel %vm1096_vm12, %v1092_v41, %v1100_v26 }
 0x645   :  { %v1070_v13 = vmul.f32 %v3192_v55, %v1066_v38  ;;  %v1108_v46 = vadd.f32 1.0, %v1104_v40  ;;  %v2352_v38 = vld [vmem:[%s3609_s3 + $0x8] sm:$0xff] }
 0x646   :  { %2625 = vmatprep.subr.bf16.mxu0 %v2624_v35  ;;  %v1103_v47 = vsub.f32 0.0, %v1095_v36  ;;  %v1113_v43 = vmul.f32 %v1109_v14, %v1009_v19  ;;  %2544 = vmatprep.subr.mxu1 %v2352_v38 }
 0x647   :  { %2627 = vmatpush3.bf16.msra.mxu0 %v2624_v35  ;;  %v1090_v63 = vmul.f32 %v2736_v51, %v1070_v13  ;;  %v1112_v48 = vmul.f32 %v1108_v46, %v1008_v61  ;;  %2545 = vmatpush3.msra.mxu1 %v2352_v38 }
 0x648   :  { %v1107_v49 = vsel %vm1099_vm13, %v1095_v36, %v1103_v47  ;;  %vm2307_vm13 = vcmask 58368  }
 0x649   :  { %v1094_v42 = vsub.f32 1.0, %v1090_v63  ;;  %v1111_v55 = vadd.f32 1.0, %v1107_v49  ;;  %v2632_v50 = vpack.c.bf16 %v1113_v43, %v1112_v48  ;;  %v3283_v49 = vld [vmem:[%s3617_s11] ss:$0 sm:$0xff] }
 0x64a   :  { %2521 = vmatmul.mubr.msk.f32.vlgmr.msra.gmra.mrb[8].mxu0 %vm460_vm4, %v631_v44 }
 0x64b   :  { %2541 = vmatprep.mubr.msk.f32.mxu0 %vm460_vm4, %v3092_v54  ;;  %v1102_v53 = vsub.f32 0.0, %v1094_v42  ;;  %2633 = vmatprep.subr.bf16.mxu0 %v2632_v50  ;;  %v1115_v29 = vmul.f32 %v1111_v55, %v1011_v56  ;;  %v633_v54 = vld [vmem:[%s3616_s10 + $0x8] sm:$0xff] }
 0x64c   :  { %2635 = vmatpush3.bf16.msra.mxu0 %v2632_v50 }
 0x64d   :  { %v1106_v45 = vsel %vm1098_vm14, %v1094_v42, %v1102_v53 }
 0x64e   :  { %v1110_v59 = vadd.f32 1.0, %v1106_v45  ;;  %v3290_v45 = vld [vmem:[%s3618_s12] ss:$0 sm:$0xff] }
 0x650   :  { %v1114_v60 = vmul.f32 %v1110_v59, %v1010_v58 }
 0x652   :  { %v2636_v62 = vpack.c.bf16 %v1115_v29, %v1114_v60 }
 0x654   :  { %2637 = vmatprep.subr.bf16.mxu0 %v2636_v62 }
 0x655   :  { %2639 = vmatpush3.bf16.msra.mxu0 %v2636_v62 }
 0x658   :  { %2542 = vmatmul.mubr.msk.f32.vlgmr.msra.gmra.mrb[10].mxu0 %vm460_vm4, %v631_v44 }
 0x71d   :  { %v2522_v10 = vpop.f32.mrb[8].mxu0 }
 0x71e   :  { %v918_v12 = vadd.f32 %v2522_v10, %v633_v54  ;;  %v912_v51 = vpop.f32.mrb[9].mxu0 }
 0x71f   :  { %v913_v30 = vadd.f32 %v912_v51, %v632_v1 }
 0x720   :  { %v3250_v21 = vadd.f32 %v918_v12, %v3056_v6 }
 0x721   :  { %v3253_v0 = vadd.f32 %v913_v30, %v3059_v17  ;;  %v2359_v30 = vld [vmem:[%s3611_s5 + $0x20] sm:$0xff] }
 0x722   :  { %v1196_v57 = vsel %vm63_vm0, %v3250_v21, 0.0 }
 0x723   :  { %1197 = vadd.xlane.f32.xlu1 %v1196_v57  ;;  %v1193_v5 = vsel %vm63_vm0, %v3253_v0, 0.0  ;;  %v2360_v57 = vld [vmem:[%s3611_s5 + $0x28] sm:$0xff] }
 0x724   :  { %1194 = vadd.xlane.f32.xlu0 %v1193_v5  ;;  %v2640_v5 = vpack.c.bf16 %v2360_v57, %v2359_v30 }
 0x726   :  { %2641 = vmatprep.subr.bf16.mxu0 %v2640_v5 }
 0x727   :  { %2643 = vmatpush3.bf16.msra.mxu0 %v2640_v5 }
 0x72b   :  { %v2543_v31 = vpop.f32.mrb[10].mxu0 }
 0x72c   :  { %v1188_v7 = vadd.f32 %v2543_v31, %v633_v54  ;;  %v1182_v8 = vpop.f32.mrb[11].mxu0  ;;  %v2361_v31 = vld [vmem:[%s3611_s5 + $0x30] sm:$0xff] }
 0x72d   :  { %v1183_v3 = vadd.f32 %v1182_v8, %v632_v1 }
 0x72e   :  { %v3260_v24 = vadd.f32 %v1188_v7, %v3066_v27  ;;  %v2362_v7 = vld [vmem:[%s3611_s5 + $0x38] sm:$0xff] }
 0x72f   :  { %v3263_v6 = vadd.f32 %v1183_v3, %v3069_v11  ;;  %v2644_v8 = vpack.c.bf16 %v2362_v7, %v2361_v31  ;;  %v2354_v3 = vld [vmem:[%s3610_s4 + $0x1] ss:$0 sm:$0xff] }
 0x730   :  { %v1202_v17 = vsel %vm63_vm0, %v3260_v24, 0.0 }
 0x731   :  { %1203 = vadd.xlane.f32.xlu1 %v1202_v17  ;;  %v1199_v18 = vsel %vm63_vm0, %v3263_v6, 0.0  ;;  %2645 = vmatprep.subr.bf16.mxu0 %v2644_v8 }
 0x732   :  { %1200 = vadd.xlane.f32.xlu0 %v1199_v18  ;;  %2647 = vmatpush3.bf16.msra.mxu0 %v2644_v8 }
 0x7b0   :  { %v1198_v52 = vpop.xlane.xlu1 %1197 }
 0x7b1   :  { %v1206_v20 = vmul.f32 0.125, %v1198_v52  ;;  %v1195_v22 = vpop.xlane.xlu0 %1194 }
 0x7b2   :  { %v1205_v23 = vmul.f32 0.125, %v1195_v22 }
 0x7b3   :  { %v1210_v15 = vsub.f32 %v3250_v21, %v1206_v20 }
 0x7b4   :  { %v1209_v27 = vsub.f32 %v3253_v0, %v1205_v23 }
 0x7b5   :  { %v1214_v28 = vmul.f32 %v1210_v15, %v1210_v15 }
 0x7b6   :  { %v1213_v2 = vmul.f32 %v1209_v27, %v1209_v27 }
 0x7b7   :  { %v1220_v11 = vsel %vm63_vm0, %v1214_v28, 0.0 }
 0x7b8   :  { %1221 = vadd.xlane.f32.xlu1 %v1220_v11  ;;  %v1217_v39 = vsel %vm63_vm0, %v1213_v2, 0.0 }
 0x7b9   :  { %1218 = vadd.xlane.f32.xlu0 %v1217_v39 }
 0x7be   :  { %v1204_v37 = vpop.xlane.xlu1 %1203 }
 0x7bf   :  { %v1208_v16 = vmul.f32 0.125, %v1204_v37  ;;  %v1201_v32 = vpop.xlane.xlu0 %1200 }
 0x7c0   :  { %v1207_v33 = vmul.f32 0.125, %v1201_v32 }
 0x7c1   :  { %v1212_v41 = vsub.f32 %v3260_v24, %v1208_v16 }
 0x7c2   :  { %v1211_v9 = vsub.f32 %v3263_v6, %v1207_v33 }
 0x7c3   :  { %v1216_v25 = vmul.f32 %v1212_v41, %v1212_v41 }
 0x7c4   :  { %v1215_v34 = vmul.f32 %v1211_v9, %v1211_v9 }
 0x7c5   :  { %v1226_v35 = vsel %vm63_vm0, %v1216_v25, 0.0 }
 0x7c6   :  { %1227 = vadd.xlane.f32.xlu1 %v1226_v35  ;;  %v1223_v26 = vsel %vm63_vm0, %v1215_v34, 0.0 }
 0x7c7   :  { %1224 = vadd.xlane.f32.xlu0 %v1223_v26 }
 0x845   :  { %v1222_v4 = vpop.xlane.xlu1 %1221 }
 0x846   :  { %v1230_v36 = vmul.f32 0.125, %v1222_v4  ;;  %v1219_v19 = vpop.xlane.xlu0 %1218 }
 0x847   :  { %v1229_v14 = vmul.f32 0.125, %v1219_v19 }
 0x848   :  { %v1234_v40 = vadd.f32 1e-05, %v1230_v36 }
 0x849   :  { %v1233_v13 = vadd.f32 1e-05, %v1229_v14 }
 0x84a   :  { %2737 = vrsqrt.f32 %v1234_v40 }
 0x84b   :  { %2739 = vrsqrt.f32 %v1233_v13 }
 0x853   :  { %v1228_v47 = vpop.xlane.xlu1 %1227 }
 0x854   :  { %v2738_v44 = vpop.eup %2737  ;;  %v1232_v43 = vmul.f32 0.125, %v1228_v47  ;;  %v1225_v63 = vpop.xlane.xlu0 %1224 }
 0x855   :  { %v2740_v61 = vpop.eup %2739  ;;  %v1242_v46 = vmul.f32 %v2738_v44, %v1210_v15  ;;  %v1231_v55 = vmul.f32 0.125, %v1225_v63 }
 0x856   :  { %v1241_v48 = vmul.f32 %v2740_v61, %v1209_v27  ;;  %v1236_v50 = vadd.f32 1e-05, %v1232_v43 }
 0x857   :  { %v1246_v42 = vmul.f32 %v3283_v49, %v1242_v46  ;;  %v1235_v56 = vadd.f32 1e-05, %v1231_v55 }
 0x858   :  { %v1245_v53 = vmul.f32 %v3283_v49, %v1241_v48  ;;  %2741 = vrsqrt.f32 %v1236_v50 }
 0x859   :  { %v1250_v58 = vadd.f32 %v3290_v45, %v1246_v42  ;;  %2743 = vrsqrt.f32 %v1235_v56 }
 0x85a   :  { %v1249_v29 = vadd.f32 %v3290_v45, %v1245_v53 }
 0x85c   :  { %2546 = vmatprep.mubr.msk.f32.mxu1 %vm63_vm0, %v1249_v29 }
 0x85d   :  { %2547 = vmatmul.mubr.msk.f32.vlgmr.msra.gmra.mrb[12].mxu1 %vm63_vm0, %v1250_v58 }
 0x862   :  { %v2742_v59 = vpop.eup %2741 }
 0x863   :  { %v2744_v60 = vpop.eup %2743  ;;  %v1244_v62 = vmul.f32 %v2742_v59, %v1212_v41 }
 0x864   :  { %v1243_v54 = vmul.f32 %v2744_v60, %v1211_v9 }
 0x865   :  { %v1248_v1 = vmul.f32 %v3283_v49, %v1244_v62 }
 0x866   :  { %v1247_v10 = vmul.f32 %v3283_v49, %v1243_v54 }
 0x867   :  { %v1252_v51 = vadd.f32 %v3290_v45, %v1248_v1 }
 0x868   :  { %v1251_v12 = vadd.f32 %v3290_v45, %v1247_v10 }
 0x86a   :  { %2549 = vmatprep.mubr.msk.f32.mxu1 %vm63_vm0, %v1251_v12 }
 0x86b   :  { %2550 = vmatmul.mubr.msk.f32.gmra.mrb[14].mxu1 %vm63_vm0, %v1252_v51 }
 0x930   :  { %v2548_v17 = vpop.f32.mrb[12].mxu1 }
 0x931   :  { %v3317_v18 = vadd.f32 %v2548_v17, %v2354_v3  ;;  %v1341_v52 = vpop.f32.mrb[13].mxu1 }
 0x932   :  { %v3319_v20 = vadd.f32 %v2354_v3, %v1341_v52 }
 0x933   :  { %v3322_v22 = vmul.f32 0.70710677, %v3317_v18 }
 0x934   :  { %v3325_v23 = vmul.f32 0.70710677, %v3319_v20 }
 0x935   :  { %v1369_v15 = vand.u32 2147483647, %v3322_v22  ;;  %vm1449_vm15 = vcmp.ge.f32.partialorder %v3322_v22, 0.0 }
 0x936   :  { %v1368_v27 = vand.u32 2147483647, %v3325_v23  ;;  %vm1448_vm1 = vcmp.ge.f32.partialorder %v3325_v23, 0.0 }
 0x937   :  { %v1373_v28 = vmul.f32 0.3275911, %v1369_v15  ;;  %v1425_v16 = vsub.f32 0.0, %v1369_v15 }
 0x938   :  { %v1372_v2 = vmul.f32 0.3275911, %v1368_v27  ;;  %v1424_v41 = vsub.f32 0.0, %v1368_v27 }
 0x939   :  { %v1377_v11 = vadd.f32 1.0, %v1373_v28  ;;  %v1429_v26 = vmul.f32 %v1425_v16, %v1369_v15 }
 0x93a   :  { %v1376_v39 = vadd.f32 1.0, %v1372_v2  ;;  %v1428_v19 = vmul.f32 %v1424_v41, %v1368_v27 }
 0x93b   :  { %2745 = vrcp.f32 %v1377_v11  ;;  %v1434_v46 = vmul.f32 1.442695, %v1429_v26 }
 0x93c   :  { %2747 = vrcp.f32 %v1376_v39  ;;  %v1432_v48 = vmul.f32 1.442695, %v1428_v19 }
 0x93e   :  { %v2551_v37 = vpop.f32.mrb[14].mxu1 }
 0x93f   :  { %v3329_v32 = vadd.f32 %v2551_v37, %v2354_v3  ;;  %v1351_v33 = vpop.f32.mrb[15].mxu1 }
 0x940   :  { %v3331_v9 = vadd.f32 %v2354_v3, %v1351_v33 }
 0x941   :  { %v3334_v25 = vmul.f32 0.70710677, %v3329_v32 }
 0x942   :  { %v3337_v34 = vmul.f32 0.70710677, %v3331_v9 }
 0x943   :  { %v1371_v38 = vand.u32 2147483647, %v3334_v25  ;;  %vm1451_vm2 = vcmp.ge.f32.partialorder %v3334_v25, 0.0  ;;  %v2364_v25 = vld [vmem:[%s3612_s6 + $0x1] ss:$0 sm:$0xff] }
 0x944   :  { %v1370_v14 = vand.u32 2147483647, %v3337_v34  ;;  %vm1450_vm3 = vcmp.ge.f32.partialorder %v3337_v34, 0.0 }
 0x945   :  { %v2746_v35 = vpop.eup %2745  ;;  %v1375_v13 = vmul.f32 0.3275911, %v1371_v38  ;;  %v1427_v60 = vsub.f32 0.0, %v1371_v38 }
 0x946   :  { %v2748_v4 = vpop.eup %2747  ;;  %v1389_v36 = vmul.f32 1.0614054, %v2746_v35  ;;  %v1374_v61 = vmul.f32 0.3275911, %v1370_v14  ;;  %v1426_v54 = vsub.f32 0.0, %v1370_v14 }
 0x947   :  { %v1388_v40 = vmul.f32 1.0614054, %v2748_v4  ;;  %v1379_v43 = vadd.f32 1.0, %v1375_v13  ;;  %v1431_v30 = vmul.f32 %v1427_v60, %v1371_v38 }
 0x948   :  { %v1393_v44 = vadd.f32 -1.4531521, %v1389_v36  ;;  %v1378_v42 = vadd.f32 1.0, %v1374_v61  ;;  %v1430_v7 = vmul.f32 %v1426_v54, %v1370_v14 }
 0x949   :  { %v1392_v47 = vadd.f32 -1.4531521, %v1388_v40  ;;  %2749 = vrcp.f32 %v1379_v43  ;;  %v1438_v2 = vmul.f32 1.442695, %v1431_v30 }
 0x94a   :  { %v1397_v63 = vmul.f32 %v2746_v35, %v1393_v44  ;;  %2751 = vrcp.f32 %v1378_v42  ;;  %v1436_v16 = vmul.f32 1.442695, %v1430_v7  ;;  %v1360_v44 = vmul.f32 0.5, %v3319_v20 }
 0x94b   :  { %v1396_v55 = vmul.f32 %v2748_v4, %v1392_v47  ;;  %2753 = vpow2.f32 %v1434_v46  ;;  %v1361_v47 = vmul.f32 0.5, %v3317_v18 }
 0x94c   :  { %v1401_v50 = vadd.f32 1.4214138, %v1397_v63  ;;  %2755 = vpow2.f32 %v1432_v48 }
 0x94d   :  { %v1400_v53 = vadd.f32 1.4214138, %v1396_v55  ;;  %2757 = vpow2.f32 %v1438_v2 }
 0x94e   :  { %v1405_v56 = vmul.f32 %v2746_v35, %v1401_v50  ;;  %2759 = vpow2.f32 %v1436_v16 }
 0x94f   :  { %v1404_v29 = vmul.f32 %v2748_v4, %v1400_v53 }
 0x950   :  { %v1409_v58 = vadd.f32 -0.28449672, %v1405_v56 }
 0x951   :  { %v1408_v59 = vadd.f32 -0.28449672, %v1404_v29 }
 0x952   :  { %v1413_v62 = vmul.f32 %v2746_v35, %v1409_v58 }
 0x953   :  { %v1412_v1 = vmul.f32 %v2748_v4, %v1408_v59  ;;  %v2750_v12 = vpop.eup %2749 }
 0x954   :  { %v1417_v10 = vadd.f32 0.2548296, %v1413_v62  ;;  %v2752_v57 = vpop.eup %2751  ;;  %v1391_v31 = vmul.f32 1.0614054, %v2750_v12 }
 0x955   :  { %v1416_v51 = vadd.f32 0.2548296, %v1412_v1  ;;  %v2754_v8 = vpop.eup %2753  ;;  %v1390_v17 = vmul.f32 1.0614054, %v2752_v57 }
 0x956   :  { %v1421_v5 = vmul.f32 %v2746_v35, %v1417_v10  ;;  %v2756_v52 = vpop.eup %2755  ;;  %v1395_v27 = vadd.f32 -1.4531521, %v1391_v31 }
 0x957   :  { %v1420_v3 = vmul.f32 %v2748_v4, %v1416_v51  ;;  %v1394_v11 = vadd.f32 -1.4531521, %v1390_v17  ;;  %v2758_v53 = vpop.eup %2757  ;;  %v1362_v51 = vmul.f32 0.5, %v3331_v9 }
 0x958   :  { %v1441_v15 = vmul.f32 %v2754_v8, %v1421_v5  ;;  %v1399_v37 = vmul.f32 %v2750_v12, %v1395_v27  ;;  %v2760_v29 = vpop.eup %2759 }
 0x959   :  { %v1440_v28 = vmul.f32 %v2756_v52, %v1420_v3  ;;  %v1398_v41 = vmul.f32 %v2752_v57, %v1394_v11 }
 0x95a   :  { %v1445_v39 = vsub.f32 1.0, %v1441_v15  ;;  %v1403_v38 = vadd.f32 1.4214138, %v1399_v37 }
 0x95b   :  { %v1444_v33 = vsub.f32 1.0, %v1440_v28  ;;  %v1402_v36 = vadd.f32 1.4214138, %v1398_v41 }
 0x95c   :  { %v1453_v26 = vsub.f32 0.0, %v1445_v39  ;;  %v1407_v19 = vmul.f32 %v2750_v12, %v1403_v38 }
 0x95d   :  { %v1452_v35 = vsub.f32 0.0, %v1444_v33  ;;  %v1406_v13 = vmul.f32 %v2752_v57, %v1402_v36 }
 0x95e   :  { %v1457_v4 = vsel %vm1449_vm15, %v1445_v39, %v1453_v26  ;;  %v1411_v46 = vadd.f32 -0.28449672, %v1407_v19 }
 0x95f   :  { %v1461_v14 = vadd.f32 1.0, %v1457_v4  ;;  %v1456_v40 = vsel %vm1448_vm1, %v1444_v33, %v1452_v35  ;;  %v1410_v43 = vadd.f32 -0.28449672, %v1406_v13 }
 0x960   :  { %v1460_v61 = vadd.f32 1.0, %v1456_v40  ;;  %v1415_v22 = vmul.f32 %v2750_v12, %v1411_v46 }
 0x961   :  { %v1465_v48 = vmul.f32 %v1461_v14, %v1361_v47  ;;  %v1414_v42 = vmul.f32 %v2752_v57, %v1410_v43  ;;  %v2369_v43 = vld [vmem:[%s3613_s7 + $0x20] sm:$0xff] }
 0x962   :  { %v1464_v63 = vmul.f32 %v1460_v61, %v1360_v44  ;;  %v1419_v55 = vadd.f32 0.2548296, %v1415_v22  ;;  %2570 = vmatprep.mubr.msk.f32.mxu1 %vm634_vm6, %v2369_v43 }
 0x963   :  { %v1418_v23 = vadd.f32 0.2548296, %v1414_v42 }
 0x964   :  { %2560 = vmatprep.mubr.msk.f32.mxu0 %vm460_vm4, %v1464_v63  ;;  %v1423_v50 = vmul.f32 %v2750_v12, %v1419_v55  ;;  %v1363_v12 = vmul.f32 0.5, %v3329_v32 }
 0x965   :  { %2561 = vmatmul.mubr.msk.f32.vlgmr.msra.gmra.mrb[12].mxu0 %vm460_vm4, %v1465_v48  ;;  %v1422_v56 = vmul.f32 %v2752_v57, %v1418_v23 }
 0x966   :  { %v1443_v20 = vmul.f32 %v2758_v53, %v1423_v50 }
 0x967   :  { %v1442_v58 = vmul.f32 %v2760_v29, %v1422_v56 }
 0x968   :  { %v1447_v59 = vsub.f32 1.0, %v1443_v20 }
 0x969   :  { %v1446_v60 = vsub.f32 1.0, %v1442_v58 }
 0x96a   :  { %v1455_v18 = vsub.f32 0.0, %v1447_v59 }
 0x96b   :  { %v1454_v62 = vsub.f32 0.0, %v1446_v60 }
 0x96c   :  { %v1459_v54 = vsel %vm1451_vm2, %v1447_v59, %v1455_v18 }
 0x96d   :  { %v1463_v1 = vadd.f32 1.0, %v1459_v54  ;;  %v1458_v10 = vsel %vm1450_vm3, %v1446_v60, %v1454_v62 }
 0x96e   :  { %v1462_v30 = vadd.f32 1.0, %v1458_v10 }
 0x96f   :  { %v1467_v5 = vmul.f32 %v1463_v1, %v1363_v12  ;;  %v2370_v12 = vld [vmem:[%s3613_s7 + $0x28] sm:$0xff] }
 0x970   :  { %v1466_v57 = vmul.f32 %v1462_v30, %v1362_v51 }
 0x972   :  { %2563 = vmatprep.mubr.msk.f32.mxu0 %vm460_vm4, %v1466_v57  ;;  %v2371_v57 = vld [vmem:[%s3613_s7 + $0x30] sm:$0xff] }
 0x973   :  { %2564 = vmatmul.mubr.msk.f32.gmra.mrb[14].mxu0 %vm460_vm4, %v1467_v5  ;;  %v2372_v5 = vld [vmem:[%s3613_s7 + $0x38] sm:$0xff] }
 0xa38   :  { %v2562_v31 = vpop.f32.mrb[12].mxu0 }
 0xa39   :  { %v1565_v7 = vadd.f32 %v2562_v31, %v2364_v25  ;;  %v1559_v34 = vpop.f32.mrb[13].mxu0 }
 0xa3a   :  { %v1560_v8 = vadd.f32 %v2364_v25, %v1559_v34 }
 0xa3b   :  { %v1579_v3 = vadd.f32 %v1565_v7, %v3250_v21 }
 0xa3c   :  { %v1578_v9 = vadd.f32 %v1560_v8, %v3253_v0 }
 0xa3d   :  { %v1585_v32 = vsel %vm63_vm0, %v1579_v3, 0.0 }
 0xa3e   :  { %1586 = vadd.xlane.f32.xlu1 %v1585_v32  ;;  %v1582_v17 = vsel %vm63_vm0, %v1578_v9, 0.0 }
 0xa3f   :  { %1583 = vadd.xlane.f32.xlu0 %v1582_v17 }
 0xa46   :  { %v2565_v52 = vpop.f32.mrb[14].mxu0 }
 0xa47   :  { %v1575_v15 = vadd.f32 %v2565_v52, %v2364_v25  ;;  %v1569_v27 = vpop.f32.mrb[15].mxu0  ;;  %v2373_v52 = vld [vmem:[%s3614_s8 + $0x20] sm:$0xff] }
 0xa48   :  { %v1570_v28 = vadd.f32 %v2364_v25, %v1569_v27 }
 0xa49   :  { %v1581_v2 = vadd.f32 %v1575_v15, %v3260_v24 }
 0xa4a   :  { %v1580_v11 = vadd.f32 %v1570_v28, %v3263_v6 }
 0xa4b   :  { %v1591_v39 = vsel %vm63_vm0, %v1581_v2, 0.0 }
 0xa4c   :  { %1592 = vadd.xlane.f32.xlu1 %v1591_v39  ;;  %v1588_v21 = vsel %vm63_vm0, %v1580_v11, 0.0 }
 0xa4d   :  { %1589 = vadd.xlane.f32.xlu0 %v1588_v21  ;;  %v3429_v21 = vld [vmem:[%s3614_s8 + $0x30] sm:$0xff] }
 0xacb   :  { %v1587_v0 = vpop.xlane.xlu1 %1586 }
 0xacc   :  { %v1595_v37 = vmul.f32 0.125, %v1587_v0  ;;  %v1584_v16 = vpop.xlane.xlu0 %1583 }
 0xacd   :  { %v1594_v33 = vmul.f32 0.125, %v1584_v16 }
 0xace   :  { %v1599_v41 = vsub.f32 %v1579_v3, %v1595_v37 }
 0xacf   :  { %v1598_v26 = vsub.f32 %v1578_v9, %v1594_v33 }
 0xad0   :  { %v1603_v38 = vmul.f32 %v1599_v41, %v1599_v41 }
 0xad1   :  { %v1602_v35 = vmul.f32 %v1598_v26, %v1598_v26 }
 0xad2   :  { %v1609_v36 = vsel %vm63_vm0, %v1603_v38, 0.0 }
 0xad3   :  { %1610 = vadd.xlane.f32.xlu1 %v1609_v36  ;;  %v1606_v24 = vsel %vm63_vm0, %v1602_v35, 0.0 }
 0xad4   :  { %1607 = vadd.xlane.f32.xlu0 %v1606_v24 }
 0xad9   :  { %v1593_v6 = vpop.xlane.xlu1 %1592 }
 0xada   :  { %v1597_v4 = vmul.f32 0.125, %v1593_v6  ;;  %v1590_v19 = vpop.xlane.xlu0 %1589 }
 0xadb   :  { %v1596_v14 = vmul.f32 0.125, %v1590_v19 }
 0xadc   :  { %v1601_v40 = vsub.f32 %v1581_v2, %v1597_v4 }
 0xadd   :  { %v1600_v13 = vsub.f32 %v1580_v11, %v1596_v14  ;;  %v2376_v11 = vld [vmem:[%s3614_s8 + $0x38] sm:$0xff] }
 0xade   :  { %v1605_v44 = vmul.f32 %v1601_v40, %v1601_v40 }
 0xadf   :  { %v1604_v61 = vmul.f32 %v1600_v13, %v1600_v13 }
 0xae0   :  { %v1615_v46 = vsel %vm63_vm0, %v1605_v44, 0.0 }
 0xae1   :  { %1616 = vadd.xlane.f32.xlu1 %v1615_v46  ;;  %v1612_v47 = vsel %vm63_vm0, %v1604_v61, 0.0 }
 0xae2   :  { %1613 = vadd.xlane.f32.xlu0 %v1612_v47 }
 0xb60   :  { %v1611_v63 = vpop.xlane.xlu1 %1610 }
 0xb61   :  { %v1619_v22 = vmul.f32 0.125, %v1611_v63  ;;  %v1608_v48 = vpop.xlane.xlu0 %1607 }
 0xb62   :  { %v1618_v42 = vmul.f32 0.125, %v1608_v48 }
 0xb63   :  { %v1623_v55 = vadd.f32 1e-05, %v1619_v22 }
 0xb64   :  { %v1622_v23 = vadd.f32 1e-05, %v1618_v42 }
 0xb65   :  { %2761 = vrsqrt.f32 %v1623_v55 }
 0xb66   :  { %2763 = vrsqrt.f32 %v1622_v23 }
 0xb6e   :  { %v1617_v56 = vpop.xlane.xlu1 %1616 }
 0xb6f   :  { %v2762_v50 = vpop.eup %2761  ;;  %v1621_v20 = vmul.f32 0.125, %v1617_v56  ;;  %v1614_v58 = vpop.xlane.xlu0 %1613 }
 0xb70   :  { %v2764_v53 = vpop.eup %2763  ;;  %v1631_v29 = vmul.f32 %v2762_v50, %v1599_v41  ;;  %v1620_v60 = vmul.f32 0.125, %v1614_v58 }
 0xb71   :  { %v1630_v59 = vmul.f32 %v2764_v53, %v1598_v26  ;;  %v1625_v62 = vadd.f32 1e-05, %v1621_v20 }
 0xb72   :  { %v1635_v18 = vmul.f32 %v3283_v49, %v1631_v29  ;;  %v1624_v1 = vadd.f32 1e-05, %v1620_v60 }
 0xb73   :  { %v1634_v54 = vmul.f32 %v3283_v49, %v1630_v59  ;;  %2765 = vrsqrt.f32 %v1625_v62 }
 0xb74   :  { %v3375_v10 = vadd.f32 %v3290_v45, %v1635_v18  ;;  %2767 = vrsqrt.f32 %v1624_v1 }
 0xb75   :  { %v3378_v51 = vadd.f32 %v3290_v45, %v1634_v54 }
 0xb77   :  { %v2648_v30 = vpack.c.bf16 %v3375_v10, %v3378_v51 }
 0xb79   :  { %2649 = vmatprep.subr.bf16.mxu1 %v2648_v30 }
 0xb7a   :  { %2651 = vmatpush3.bf16.msra.mxu1 %v2648_v30 }
 0xb7d   :  { %2571 = vmatmul.mubr.msk.f32.vlgmr.msra.gmra.mrb[16].mxu1 %vm634_vm6, %v2370_v12  ;;  %v2766_v25 = vpop.eup %2765 }
 0xb7e   :  { %2573 = vmatprep.mubr.msk.f32.mxu1 %vm634_vm6, %v2371_v57  ;;  %v2768_v31 = vpop.eup %2767  ;;  %v1633_v7 = vmul.f32 %v2766_v25, %v1601_v40 }
 0xb7f   :  { %v1632_v34 = vmul.f32 %v2768_v31, %v1600_v13 }
 0xb80   :  { %v1637_v8 = vmul.f32 %v3283_v49, %v1633_v7 }
 0xb81   :  { %2574 = vmatmul.mubr.msk.f32.gmra.mrb[18].mxu1 %vm634_vm6, %v2372_v5  ;;  %v1636_v3 = vmul.f32 %v3283_v49, %v1632_v34  ;;  %v3411_v49 = vld [vmem:[%s3615_s9 + $0x10] sm:$0xff] }
 0xb82   :  { %2591 = vmatprep.mubr.msk.f32.mxu1 %vm634_vm6, %v2369_v43  ;;  %v3398_v9 = vadd.f32 %v3290_v45, %v1637_v8  ;;  %2584 = vmatprep.mubr.msk.f32.mxu0 %vm460_vm4, %v3411_v49 }
 0xb83   :  { %v3401_v32 = vadd.f32 %v3290_v45, %v1636_v3  ;;  %v2374_v45 = vld [vmem:[%s3614_s8 + $0x28] sm:$0xff] }
 0xb85   :  { %v2660_v17 = vpack.c.bf16 %v3398_v9, %v3401_v32 }
 0xb87   :  { %2661 = vmatprep.subr.bf16.mxu1 %v2660_v17 }
 0xb88   :  { %2663 = vmatpush3.bf16.msra.mxu1 %v2660_v17 }
 0xb8b   :  { %2592 = vmatmul.mubr.msk.f32.vlgmr.msra.gmra.mrb[20].mxu1 %vm634_vm6, %v2370_v12 }
 0xb8c   :  { %2594 = vmatprep.mubr.msk.f32.mxu1 %vm634_vm6, %v2371_v57 }
 0xb8f   :  { %2595 = vmatmul.mubr.msk.f32.gmra.mrb[22].mxu1 %vm634_vm6, %v2372_v5 }
 0xc50   :  { %v2572_v15 = vpop.f32.mrb[16].mxu1 }
 0xc51   :  { %v1742_v27 = vadd.f32 %v2572_v15, %v2374_v45  ;;  %v1736_v28 = vpop.f32.mrb[17].mxu1 }
 0xc52   :  { %v1737_v2 = vadd.f32 %v2373_v52, %v1736_v28 }
 0xc53   :  { %v3424_v39 = vmul.f32 0.70710677, %v1742_v27  ;;  %v3449_v20 = vmul.f32 0.5, %v1742_v27 }
 0xc54   :  { %v3431_v0 = vmul.f32 0.70710677, %v1737_v2  ;;  %v2575_v37 = vpop.f32.mrb[18].mxu1  ;;  %v3451_v58 = vmul.f32 0.5, %v1737_v2 }
 0xc55   :  { %v1764_v16 = vand.u32 2147483647, %v3424_v39  ;;  %v1752_v33 = vadd.f32 %v2575_v37, %v2376_v11  ;;  %v1746_v41 = vpop.f32.mrb[19].mxu1  ;;  %vm1844_vm5 = vcmp.ge.f32.partialorder %v3424_v39, 0.0 }
 0xc56   :  { %v1763_v26 = vand.u32 2147483647, %v3431_v0  ;;  %v1747_v38 = vadd.f32 %v3429_v21, %v1746_v41  ;;  %vm1843_vm6 = vcmp.ge.f32.partialorder %v3431_v0, 0.0 }
 0xc57   :  { %v1768_v35 = vmul.f32 0.3275911, %v1764_v16  ;;  %v3436_v36 = vmul.f32 0.70710677, %v1752_v33  ;;  %v1820_v61 = vsub.f32 0.0, %v1764_v16  ;;  %v3458_v1 = vmul.f32 0.5, %v1752_v33 }
 0xc58   :  { %v1767_v24 = vmul.f32 0.3275911, %v1763_v26  ;;  %v3438_v6 = vmul.f32 0.70710677, %v1747_v38  ;;  %v1819_v47 = vsub.f32 0.0, %v1763_v26  ;;  %v3470_v28 = vmul.f32 0.5, %v1747_v38 }
 0xc59   :  { %v1772_v4 = vadd.f32 1.0, %v1768_v35  ;;  %v1766_v19 = vand.u32 2147483647, %v3436_v36  ;;  %v1824_v42 = vmul.f32 %v1820_v61, %v1764_v16  ;;  %vm1846_vm7 = vcmp.ge.f32.partialorder %v3436_v36, 0.0 }
 0xc5a   :  { %v1771_v14 = vadd.f32 1.0, %v1767_v24  ;;  %v1765_v40 = vand.u32 2147483647, %v3438_v6  ;;  %v1823_v50 = vmul.f32 %v1819_v47, %v1763_v26  ;;  %vm1845_vm8 = vcmp.ge.f32.partialorder %v3438_v6, 0.0 }
 0xc5b   :  { %2769 = vrcp.f32 %v1772_v4  ;;  %v1770_v13 = vmul.f32 0.3275911, %v1766_v19  ;;  %v1822_v63 = vsub.f32 0.0, %v1766_v19  ;;  %v1829_v54 = vmul.f32 1.442695, %v1824_v42 }
 0xc5c   :  { %2771 = vrcp.f32 %v1771_v14  ;;  %v1769_v44 = vmul.f32 0.3275911, %v1765_v40  ;;  %v1821_v22 = vsub.f32 0.0, %v1765_v40  ;;  %v1827_v31 = vmul.f32 1.442695, %v1823_v50 }
 0xc5d   :  { %v1774_v46 = vadd.f32 1.0, %v1770_v13  ;;  %v1826_v56 = vmul.f32 %v1822_v63, %v1766_v19 }
 0xc5e   :  { %v1773_v43 = vadd.f32 1.0, %v1769_v44  ;;  %v2593_v48 = vpop.f32.mrb[20].mxu1  ;;  %v1825_v59 = vmul.f32 %v1821_v22, %v1765_v40 }
 0xc5f   :  { %2773 = vrcp.f32 %v1774_v46  ;;  %v3442_v55 = vadd.f32 %v2593_v48, %v2374_v45  ;;  %v2012_v23 = vpop.f32.mrb[21].mxu1  ;;  %v1833_v8 = vmul.f32 1.442695, %v1826_v56 }
 0xc60   :  { %2775 = vrcp.f32 %v1773_v43  ;;  %v3444_v53 = vadd.f32 %v2373_v52, %v2012_v23  ;;  %v1831_v45 = vmul.f32 1.442695, %v1825_v59 }
 0xc61   :  { %v3447_v29 = vmul.f32 0.70710677, %v3442_v55 }
 0xc62   :  { %v3454_v60 = vmul.f32 0.70710677, %v3444_v53  ;;  %v2596_v18 = vpop.f32.mrb[22].mxu1 }
 0xc63   :  { %v2040_v30 = vand.u32 2147483647, %v3447_v29  ;;  %v3461_v12 = vadd.f32 %v2596_v18, %v2376_v11  ;;  %v2022_v57 = vpop.f32.mrb[23].mxu1  ;;  %vm2120_vm9 = vcmp.ge.f32.partialorder %v3447_v29, 0.0  ;;  %v2031_v29 = vmul.f32 0.5, %v3444_v53 }
 0xc64   :  { %v2039_v7 = vand.u32 2147483647, %v3454_v60  ;;  %v3482_v38 = vadd.f32 %v3429_v21, %v2022_v57  ;;  %vm2119_vm10 = vcmp.ge.f32.partialorder %v3454_v60, 0.0 }
 0xc65   :  { %v3456_v62 = vpop.eup %2769  ;;  %v2044_v3 = vmul.f32 0.3275911, %v2040_v30  ;;  %v3473_v11 = vmul.f32 0.70710677, %v3461_v12  ;;  %v2096_v41 = vsub.f32 0.0, %v2040_v30  ;;  %v2034_v53 = vmul.f32 0.5, %v3461_v12 }
 0xc66   :  { %v3463_v5 = vpop.eup %2771  ;;  %v1784_v25 = vmul.f32 1.0614054, %v3456_v62  ;;  %v2043_v52 = vmul.f32 0.3275911, %v2039_v7  ;;  %v2095_v14 = vsub.f32 0.0, %v2039_v7  ;;  %v2379_v12 = vld [vmem:[%s3616_s10 + $0x10] sm:$0xff] }
 0xc67   :  { %v1783_v34 = vmul.f32 1.0614054, %v3463_v5  ;;  %v2048_v2 = vadd.f32 1.0, %v2044_v3  ;;  %v2042_v44 = vand.u32 2147483647, %v3473_v11  ;;  %v2100_v47 = vmul.f32 %v2096_v41, %v2040_v30 }
 0xc68   :  { %v1788_v17 = vadd.f32 -1.4531521, %v1784_v25  ;;  %v2047_v26 = vadd.f32 1.0, %v2043_v52  ;;  %v3490_v42 = vmul.f32 0.70710677, %v3482_v38  ;;  %v2099_v56 = vmul.f32 %v2095_v14, %v2039_v7 }
 0xc69   :  { %v3468_v15 = vpop.eup %2773  ;;  %v1787_v27 = vadd.f32 -1.4531521, %v1783_v34  ;;  %2777 = vrcp.f32 %v2048_v2  ;;  %v2046_v63 = vmul.f32 0.3275911, %v2042_v44  ;;  %v2105_v30 = vmul.f32 1.442695, %v2100_v47 }
 0xc6a   :  { %v3475_v37 = vpop.eup %2775  ;;  %v1792_v16 = vmul.f32 %v3456_v62, %v1788_v17  ;;  %v1786_v33 = vmul.f32 1.0614054, %v3468_v15  ;;  %2779 = vrcp.f32 %v2047_v26  ;;  %v3495_v57 = vand.u32 2147483647, %v3490_v42 }
 0xc6b   :  { %v1791_v35 = vmul.f32 %v3463_v5, %v1787_v27  ;;  %v1785_v24 = vmul.f32 1.0614054, %v3475_v37  ;;  %2781 = vpow2.f32 %v1829_v54  ;;  %v2050_v59 = vadd.f32 1.0, %v2046_v63 }
 0xc6c   :  { %v1796_v4 = vadd.f32 1.4214138, %v1792_v16  ;;  %v1790_v19 = vadd.f32 -1.4531521, %v1786_v33  ;;  %2783 = vpow2.f32 %v1827_v31  ;;  %v2098_v34 = vsub.f32 0.0, %v2042_v44 }
 0xc6d   :  { %v1795_v40 = vadd.f32 1.4214138, %v1791_v35  ;;  %v1789_v13 = vadd.f32 -1.4531521, %v1785_v24  ;;  %2785 = vpow2.f32 %v1833_v8  ;;  %v2045_v17 = vmul.f32 0.3275911, %v3495_v57 }
 0xc6e   :  { %v1800_v61 = vmul.f32 %v3456_v62, %v1796_v4  ;;  %v1794_v46 = vmul.f32 %v3468_v15, %v1790_v19  ;;  %2787 = vpow2.f32 %v1831_v45  ;;  %v2103_v27 = vmul.f32 1.442695, %v2099_v56 }
 0xc6f   :  { %v1799_v43 = vmul.f32 %v3463_v5, %v1795_v40  ;;  %v1793_v21 = vmul.f32 %v3475_v37, %v1789_v13  ;;  %2789 = vrcp.f32 %v2050_v59  ;;  %v2049_v26 = vadd.f32 1.0, %v2045_v17 }
 0xc70   :  { %v1804_v22 = vadd.f32 -0.28449672, %v1800_v61  ;;  %v1798_v48 = vadd.f32 1.4214138, %v1794_v46  ;;  %v2102_v14 = vmul.f32 %v2098_v34, %v2042_v44  ;;  %vm2122_vm11 = vcmp.ge.f32.partialorder %v3473_v11, 0.0  ;;  %v2380_v11 = vld [vmem:[%s3616_s10 + $0x18] sm:$0xff] }
 0xc71   :  { %v1803_v23 = vadd.f32 -0.28449672, %v1799_v43  ;;  %v1797_v50 = vadd.f32 1.4214138, %v1793_v21  ;;  %2791 = vrcp.f32 %v2049_v26  ;;  %vm2121_vm12 = vcmp.ge.f32.partialorder %v3490_v42, 0.0 }
 0xc72   :  { %v1808_v18 = vmul.f32 %v3456_v62, %v1804_v22  ;;  %v1802_v54 = vmul.f32 %v3468_v15, %v1798_v48  ;;  %2793 = vpow2.f32 %v2105_v30 }
 0xc73   :  { %v1807_v25 = vmul.f32 %v3463_v5, %v1803_v23  ;;  %v1801_v31 = vmul.f32 %v3475_v37, %v1797_v50  ;;  %v3500_v7 = vpop.eup %2777  ;;  %2795 = vpow2.f32 %v2103_v27 }
 0xc74   :  { %v1812_v8 = vadd.f32 0.2548296, %v1808_v18  ;;  %v1806_v3 = vadd.f32 -0.28449672, %v1802_v54  ;;  %v3503_v2 = vpop.eup %2779  ;;  %v2060_v41 = vmul.f32 1.0614054, %v3500_v7 }
 0xc75   :  { %v1811_v45 = vadd.f32 0.2548296, %v1807_v25  ;;  %v1805_v52 = vadd.f32 -0.28449672, %v1801_v31  ;;  %v2782_v35 = vpop.eup %2781  ;;  %v2059_v19 = vmul.f32 1.0614054, %v3503_v2 }
 0xc76   :  { %v1816_v16 = vmul.f32 %v3456_v62, %v1812_v8  ;;  %v1810_v33 = vmul.f32 %v3468_v15, %v1806_v3  ;;  %v2784_v40 = vpop.eup %2783  ;;  %v2064_v46 = vadd.f32 -1.4531521, %v2060_v41  ;;  %v2109_v54 = vmul.f32 1.442695, %v2102_v14 }
 0xc77   :  { %v1815_v24 = vmul.f32 %v3463_v5, %v1811_v45  ;;  %v1809_v4 = vmul.f32 %v3475_v37, %v1805_v52  ;;  %v2786_v62 = vpop.eup %2785  ;;  %v2063_v21 = vadd.f32 -1.4531521, %v2059_v19  ;;  %v2097_v8 = vsub.f32 0.0, %v3495_v57 }
 0xc78   :  { %v1836_v13 = vmul.f32 %v2782_v35, %v1816_v16  ;;  %v1814_v61 = vadd.f32 0.2548296, %v1810_v33  ;;  %v2788_v63 = vpop.eup %2787  ;;  %v2068_v48 = vmul.f32 %v3500_v7, %v2064_v46  ;;  %2797 = vpow2.f32 %v2109_v54 }
 0xc79   :  { %v1835_v47 = vmul.f32 %v2784_v40, %v1815_v24  ;;  %v1813_v43 = vadd.f32 0.2548296, %v1809_v4  ;;  %v2067_v50 = vmul.f32 %v3503_v2, %v2063_v21  ;;  %v3518_v25 = vpop.eup %2789  ;;  %v2101_v19 = vmul.f32 %v2097_v8, %v3495_v57 }
 0xc7a   :  { %v1840_v22 = vsub.f32 1.0, %v1836_v13  ;;  %v1818_v5 = vmul.f32 %v3468_v15, %v1814_v61  ;;  %v2072_v18 = vadd.f32 1.4214138, %v2068_v48  ;;  %v2062_v17 = vmul.f32 1.0614054, %v3518_v25 }
 0xc7b   :  { %v1839_v44 = vsub.f32 1.0, %v1835_v47  ;;  %v1817_v23 = vmul.f32 %v3475_v37, %v1813_v43  ;;  %v2071_v15 = vadd.f32 1.4214138, %v2067_v50  ;;  %v2792_v14 = vpop.eup %2791  ;;  %v2107_v50 = vmul.f32 1.442695, %v2101_v19 }
 0xc7c   :  { %v1848_v56 = vsub.f32 0.0, %v1840_v22  ;;  %v1838_v59 = vmul.f32 %v2786_v62, %v1818_v5  ;;  %v2076_v37 = vmul.f32 %v3500_v7, %v2072_v18  ;;  %v2066_v35 = vadd.f32 -1.4531521, %v2062_v17  ;;  %v2794_v43 = vpop.eup %2793 }
 0xc7d   :  { %v1847_v31 = vsub.f32 0.0, %v1839_v44  ;;  %v1837_v34 = vmul.f32 %v2788_v63, %v1817_v23  ;;  %v2075_v16 = vmul.f32 %v3503_v2, %v2071_v15  ;;  %v2061_v47 = vmul.f32 1.0614054, %v2792_v14 }
 0xc7e   :  { %v1852_v30 = vsel %vm1844_vm5, %v1840_v22, %v1848_v56  ;;  %v1842_v3 = vsub.f32 1.0, %v1838_v59  ;;  %v2080_v26 = vadd.f32 -0.28449672, %v2076_v37  ;;  %v2070_v61 = vmul.f32 %v3518_v25, %v2066_v35 }
 0xc7f   :  { %v1856_v45 = vadd.f32 1.0, %v1852_v30  ;;  %v1851_v52 = vsel %vm1843_vm6, %v1839_v44, %v1847_v31  ;;  %v1841_v27 = vsub.f32 1.0, %v1837_v34  ;;  %v2079_v4 = vadd.f32 -0.28449672, %v2075_v16  ;;  %v2378_v30 = vld [vmem:[%s3615_s9 + $0x18] sm:$0xff] }
 0xc80   :  { %v1855_v33 = vadd.f32 1.0, %v1851_v52  ;;  %v1850_v41 = vsub.f32 0.0, %v1842_v3  ;;  %v2084_v13 = vmul.f32 %v3500_v7, %v2080_v26  ;;  %v2074_v63 = vadd.f32 1.4214138, %v2070_v61 }
 0xc81   :  { %v1860_v24 = vmul.f32 %v1856_v45, %v3449_v20  ;;  %v1849_v39 = vsub.f32 0.0, %v1841_v27  ;;  %v2083_v20 = vmul.f32 %v3503_v2, %v2079_v4  ;;  %v2065_v48 = vadd.f32 -1.4531521, %v2061_v47 }
 0xc82   :  { %v1859_v40 = vmul.f32 %v1855_v33, %v3451_v58  ;;  %v1854_v0 = vsel %vm1846_vm7, %v1842_v3, %v1850_v41  ;;  %v2088_v57 = vadd.f32 0.2548296, %v2084_v13  ;;  %v2796_v58 = vpop.eup %2795  ;;  %v2078_v6 = vmul.f32 %v3518_v25, %v2074_v63 }
 0xc83   :  { %v1858_v46 = vadd.f32 1.0, %v1854_v0  ;;  %v1853_v62 = vsel %vm1845_vm8, %v1841_v27, %v1849_v39  ;;  %v2087_v5 = vadd.f32 0.2548296, %v2083_v20  ;;  %v2069_v59 = vmul.f32 %v2792_v14, %v2065_v48  ;;  %v2798_v27 = vpop.eup %2797 }
 0xc84   :  { %v1857_v21 = vadd.f32 1.0, %v1853_v62  ;;  %v2652_v22 = vpack.c.bf16 %v1860_v24, %v1859_v40  ;;  %v2092_v23 = vmul.f32 %v3500_v7, %v2088_v57  ;;  %v2082_v31 = vadd.f32 -0.28449672, %v2078_v6 }
 0xc85   :  { %v1862_v36 = vmul.f32 %v1858_v46, %v3458_v1  ;;  %v2091_v56 = vmul.f32 %v3503_v2, %v2087_v5  ;;  %v2073_v1 = vadd.f32 1.4214138, %v2069_v59  ;;  %2799 = vpow2.f32 %v2107_v50 }
 0xc86   :  { %v1861_v44 = vmul.f32 %v1857_v21, %v3470_v28  ;;  %2653 = vmatprep.subr.bf16.mxu0 %v2652_v22  ;;  %v2112_v18 = vmul.f32 %v2794_v43, %v2092_v23  ;;  %v2086_v54 = vmul.f32 %v3518_v25, %v2082_v31  ;;  %v2032_v16 = vmul.f32 0.5, %v3442_v55 }
 0xc87   :  { %2655 = vmatpush3.bf16.msra.mxu0 %v2652_v22  ;;  %v2111_v15 = vmul.f32 %v2796_v58, %v2091_v56  ;;  %v2077_v7 = vmul.f32 %v2792_v14, %v2073_v1 }
 0xc88   :  { %v2656_v34 = vpack.c.bf16 %v1862_v36, %v1861_v44  ;;  %v2116_v8 = vsub.f32 1.0, %v2112_v18  ;;  %v2090_v3 = vadd.f32 0.2548296, %v2086_v54 }
 0xc89   :  { %v2115_v28 = vsub.f32 1.0, %v2111_v15  ;;  %v2081_v17 = vadd.f32 -0.28449672, %v2077_v7 }
 0xc8a   :  { %2657 = vmatprep.subr.bf16.mxu0 %v2656_v34  ;;  %v2124_v2 = vsub.f32 0.0, %v2116_v8  ;;  %v2094_v52 = vmul.f32 %v3518_v25, %v2090_v3 }
 0xc8b   :  { %2659 = vmatpush3.bf16.msra.mxu0 %v2656_v34  ;;  %v2123_v37 = vsub.f32 0.0, %v2115_v28  ;;  %v2085_v26 = vmul.f32 %v2792_v14, %v2081_v17 }
 0xc8c   :  { %v2128_v45 = vsel %vm2120_vm9, %v2116_v8, %v2124_v2  ;;  %v2114_v24 = vmul.f32 %v2798_v27, %v2094_v52 }
 0xc8d   :  { %v2132_v33 = vadd.f32 1.0, %v2128_v45  ;;  %v2127_v41 = vsel %vm2119_vm10, %v2115_v28, %v2123_v37  ;;  %v2089_v4 = vadd.f32 0.2548296, %v2085_v26 }
 0xc8e   :  { %2585 = vmatmul.mubr.msk.f32.vlgmr.msra.gmra.mrb[16].mxu0 %vm460_vm4, %v2378_v30  ;;  %v2131_v35 = vadd.f32 1.0, %v2127_v41  ;;  %v2118_v19 = vsub.f32 1.0, %v2114_v24 }
 0xc8f   :  { %2605 = vmatprep.mubr.msk.f32.mxu0 %vm460_vm4, %v3411_v49  ;;  %v2136_v39 = vmul.f32 %v2132_v33, %v2032_v16  ;;  %v2093_v25 = vmul.f32 %v2792_v14, %v2089_v4  ;;  %v2800_v40 = vpop.eup %2799  ;;  %v2033_v14 = vmul.f32 0.5, %v3482_v38 }
 0xc90   :  { %v2135_v60 = vmul.f32 %v2131_v35, %v2031_v29  ;;  %v2126_v0 = vsub.f32 0.0, %v2118_v19 }
 0xc91   :  { %v2113_v55 = vmul.f32 %v2800_v40, %v2093_v25 }
 0xc92   :  { %v2664_v13 = vpack.c.bf16 %v2136_v39, %v2135_v60  ;;  %v2130_v61 = vsel %vm2122_vm11, %v2118_v19, %v2126_v0 }
 0xc93   :  { %v2117_v46 = vsub.f32 1.0, %v2113_v55  ;;  %v2134_v49 = vadd.f32 1.0, %v2130_v61 }
 0xc94   :  { %2665 = vmatprep.subr.bf16.mxu0 %v2664_v13 }
 0xc95   :  { %2667 = vmatpush3.bf16.msra.mxu0 %v2664_v13  ;;  %v2125_v62 = vsub.f32 0.0, %v2117_v46  ;;  %v2138_v47 = vmul.f32 %v2134_v49, %v2034_v53 }
 0xc97   :  { %v2129_v20 = vsel %vm2121_vm12, %v2117_v46, %v2125_v62 }
 0xc98   :  { %v2133_v43 = vadd.f32 1.0, %v2129_v20  ;;  %v2216_v20 = vld [vmem:[%s3619_s13] sm:$0xff] }
 0xc9a   :  { %v2137_v21 = vmul.f32 %v2133_v43, %v2033_v14 }
 0xc9c   :  { %v2668_v57 = vpack.c.bf16 %v2138_v47, %v2137_v21  ;;  %v2217_v47 = vld [vmem:[%s3619_s13 + $0x8] sm:$0xff]  ;;  %s2831_s13 = smov [#allocation2]  }
 0xc9e   :  { %2669 = vmatprep.subr.bf16.mxu0 %v2668_v57 }
 0xc9f   :  { %2671 = vmatpush3.bf16.msra.mxu0 %v2668_v57  ;;  %v2218_v57 = vld [vmem:[%s3620_s14] sm:$0xff] }
 0xca2   :  { %2606 = vmatmul.mubr.msk.f32.vlgmr.msra.gmra.mrb[18].mxu0 %vm460_vm4, %v2378_v30  ;;  %vm2305_vm4 = vcmask 1040384  }
 0xd61   :  { %v2586_v42 = vpop.f32.mrb[16].mxu0 }
 0xd62   :  { %v1941_v63 = vadd.f32 %v2586_v42, %v2380_v11  ;;  %v1935_v22 = vpop.f32.mrb[17].mxu0 }
 0xd63   :  { %v1936_v58 = vadd.f32 %v2379_v12, %v1935_v22 }
 0xd64   :  { %v1945_v38 = vadd.f32 %v1941_v63, %v3375_v10 }
 0xd65   :  { %v1944_v36 = vadd.f32 %v1936_v58, %v3378_v51 }
 0xd66   :  { %v2221_v5 = vsel %vm63_vm0, %v1945_v38, 0.0 }
 0xd67   :  { %v2220_v48 = vsel %vm63_vm0, %v1944_v36, 0.0 }
 0xd68   :  { %v2222_v44 = vadd.f32 %v2221_v5, %v2220_v48 }
 0xd6a   :  { %v2223_v23 = vrot.slane %v2222_v44, 4 }
 0xd6c   :  { %v2224_v6 = vadd.f32 %v2223_v23, %v2222_v44 }
 0xd6e   :  { %v2225_v50 = vrot.slane %v2224_v6, 2 }
 0xd70   :  { %v2226_v56 = vadd.f32 %v2225_v50, %v2224_v6 }
 0xd72   :  { %v2227_v59 = vrot.slane %v2226_v56, 1 }
 0xd74   :  { %v2228_v18 = vadd.f32 %v2227_v59, %v2226_v56 }
 0xd75   :  { %v2607_v1 = vpop.f32.mrb[18].mxu0 }
 0xd76   :  { %v2230_v31 = vmul.f32 0.0625, %v2228_v18  ;;  %v2211_v10 = vadd.f32 %v2607_v1, %v2380_v11  ;;  %v2205_v28 = vpop.f32.mrb[19].mxu0  ;;  %v2219_v11 = vld [vmem:[%s3620_s14 + $0x8] sm:$0xff]  ;;  %s2315_s14 = sshll.u32 %s2831_s13, 4  ;;  %s2316_s14 = int_to_ptr.vmem [resolvable:$true] %s2315_s14 }
 0xd77   :  { %v2206_v51 = vadd.f32 %v2379_v12, %v2205_v28  ;;  %s2807_s16 = scalar_lea.vmem %s2316_s14, 32  ;;  %p2812_p1 = scmp.lt.s32.totalorder %s2316_s14, %s2316_s14 }
 0xd78   :  { %v2231_v34 = vsub.f32 %v1944_v36, %v2230_v31  ;;  %v2232_v15 = vsub.f32 %v1945_v38, %v2230_v31  ;;  %v2215_v2 = vadd.f32 %v2211_v10, %v3398_v9  ;;  %p2808_p0 = scmp.ne.s32.totalorder %s2316_s14, %s2807_s16  ;;  %p2813_p2 = scmp.lt.s32.totalorder %s2807_s16, %s2807_s16 }
 0xd79   :  { %v2214_v37 = vadd.f32 %v2206_v51, %v3401_v32 }
 0xd7a   :  { %v2233_v8 = vmul.f32 %v2231_v34, %v2231_v34  ;;  %v2234_v54 = vmul.f32 %v2232_v15, %v2232_v15  ;;  %v2264_v17 = vsel %vm63_vm0, %v2215_v2, 0.0  ;;  %p2814_p3 = por %p2813_p2, %p2812_p1 }
 0xd7b   :  { %v2263_v52 = vsel %vm63_vm0, %v2214_v37, 0.0 }
 0xd7c   :  { %v2235_v7 = vsel %vm63_vm0, %v2233_v8, 0.0  ;;  %v2236_v30 = vsel %vm63_vm0, %v2234_v54, 0.0  ;;  %v2265_v27 = vadd.f32 %v2264_v17, %v2263_v52  ;;  %p2815_p4 = pnand %p2814_p3, %p2808_p0 }
 0xd7d   :  { %v2237_v3 = vadd.f32 %v2236_v30, %v2235_v7 }
 0xd7e   :  { %v2266_v33 = vrot.slane %v2265_v27, 4 }
 0xd7f   :  { %v2238_v45 = vrot.slane %v2237_v3, 4 }
 0xd80   :  { %v2267_v26 = vadd.f32 %v2266_v33, %v2265_v27 }
 0xd81   :  { %v2239_v16 = vadd.f32 %v2238_v45, %v2237_v3 }
 0xd82   :  { %v2268_v35 = vrot.slane %v2267_v26, 2 }
 0xd83   :  { %v2240_v41 = vrot.slane %v2239_v16, 2 }
 0xd84   :  { %v2269_v39 = vadd.f32 %v2268_v35, %v2267_v26 }
 0xd85   :  { %v2241_v29 = vadd.f32 %v2240_v41, %v2239_v16 }
 0xd86   :  { %v2270_v60 = vrot.slane %v2269_v39, 1 }
 0xd87   :  { %v2242_v24 = vrot.slane %v2241_v29, 1 }
 0xd88   :  { %v2271_v19 = vadd.f32 %v2270_v60, %v2269_v39 }
 0xd89   :  { %v2243_v4 = vadd.f32 %v2242_v24, %v2241_v29 }
 0xd8a   :  { %v2272_v32 = vmul.f32 0.0625, %v2271_v19 }
 0xd8b   :  { %v2244_v9 = vmul.f32 0.0625, %v2243_v4 }
 0xd8c   :  { %v2273_v40 = vsub.f32 %v2214_v37, %v2272_v32  ;;  %v2274_v0 = vsub.f32 %v2215_v2, %v2272_v32 }
 0xd8d   :  { %v2245_v25 = vadd.f32 1e-05, %v2244_v9 }
 0xd8e   :  { %v2275_v13 = vmul.f32 %v2273_v40, %v2273_v40  ;;  %v2276_v55 = vmul.f32 %v2274_v0, %v2274_v0 }
 0xd8f   :  { %2801 = vrsqrt.f32 %v2245_v25 }
 0xd90   :  { %v2277_v61 = vsel %vm63_vm0, %v2275_v13, 0.0  ;;  %v2278_v46 = vsel %vm63_vm0, %v2276_v55, 0.0 }
 0xd91   :  { %v2279_v49 = vadd.f32 %v2278_v46, %v2277_v61 }
 0xd93   :  { %v2280_v62 = vrot.slane %v2279_v49, 4 }
 0xd95   :  { %v2281_v14 = vadd.f32 %v2280_v62, %v2279_v49 }
 0xd97   :  { %v2282_v12 = vrot.slane %v2281_v14, 2 }
 0xd99   :  { %v2802_v53 = vpop.eup %2801  ;;  %v2283_v22 = vadd.f32 %v2282_v12, %v2281_v14 }
 0xd9a   :  { %v2247_v43 = vmul.f32 %v2802_v53, %v2231_v34  ;;  %v2248_v21 = vmul.f32 %v2802_v53, %v2232_v15 }
 0xd9b   :  { %v2284_v36 = vrot.slane %v2283_v22, 1 }
 0xd9c   :  { %v2249_v42 = vmul.f32 %v2247_v43, %v2216_v20  ;;  %v2250_v63 = vmul.f32 %v2248_v21, %v2217_v47 }
 0xd9d   :  { %v2285_v23 = vadd.f32 %v2284_v36, %v2283_v22 }
 0xd9e   :  { %v2251_v58 = vadd.f32 %v2249_v42, %v2218_v57  ;;  %v2252_v38 = vadd.f32 %v2250_v63, %v2219_v11 }
 0xd9f   :  { %v2286_v6 = vmul.f32 0.0625, %v2285_v23 }
 0xda0   :  { %v2253_v5 = vsel %vm63_vm0, %v2251_v58, 0.0  ;;  %v2254_v48 = vsel %vm63_vm0, %v2252_v38, 0.0 }
 0xda1   :  { %v2255_v44 = vadd.f32 %v2254_v48, %v2253_v5  ;;  %v2287_v50 = vadd.f32 1e-05, %v2286_v6 }
 0xda3   :  { %2803 = vrsqrt.f32 %v2287_v50  ;;  %v2256_v56 = vrot.slane %v2255_v44, 4 }
 0xda5   :  { %v2257_v34 = vadd.f32 %v2256_v56, %v2255_v44 }
 0xda7   :  { %v2258_v10 = vrot.slane %v2257_v34, 2 }
 0xda9   :  { %v2259_v30 = vadd.f32 %v2258_v10, %v2257_v34 }
 0xdab   :  { %v2260_v37 = vrot.slane %v2259_v30, 1 }
 0xdad   :  { %v2804_v59 = vpop.eup %2803  ;;  %v2261_v52 = vadd.f32 %v2260_v37, %v2259_v30 }
 0xdae   :  { %v2289_v18 = vmul.f32 %v2804_v59, %v2273_v40  ;;  %v2290_v31 = vmul.f32 %v2804_v59, %v2274_v0 }
 0xdaf   :  { %v2262_v33 = vmul.f32 0.0625, %v2261_v52 }
 0xdb0   :  { %v2291_v15 = vmul.f32 %v2289_v18, %v2216_v20  ;;  %v2292_v1 = vmul.f32 %v2290_v31, %v2217_v47 }
 0xdb2   :  { %v2293_v8 = vadd.f32 %v2291_v15, %v2218_v57  ;;  %v2294_v54 = vadd.f32 %v2292_v1, %v2219_v11 }
 0xdb4   :  { %v2295_v28 = vsel %vm63_vm0, %v2293_v8, 0.0  ;;  %v2296_v51 = vsel %vm63_vm0, %v2294_v54, 0.0 }
 0xdb5   :  { %v2297_v7 = vadd.f32 %v2296_v51, %v2295_v28 }
 0xdb7   :  { %v2298_v2 = vrot.slane %v2297_v7, 4 }
 0xdb9   :  { %v2299_v3 = vadd.f32 %v2298_v2, %v2297_v7 }
 0xdbb   :  { %v2300_v17 = vrot.slane %v2299_v3, 2 }
 0xdbd   :  { %v2301_v45 = vadd.f32 %v2300_v17, %v2299_v3 }
 0xdbf   :  { %v2302_v27 = vrot.slane %v2301_v45, 1 }
 0xdc1   :  { %v2303_v16 = vadd.f32 %v2302_v27, %v2301_v45 }
 0xdc3   :  { %v2304_v41 = vmul.f32 0.0625, %v2303_v16 }
 0xdc5   :  { %v2306_v26 = vsel %vm2305_vm4, %v2262_v33, %v2304_v41 }
 0xdc6   :  { %2308 = vst.msk [vmem:[#allocation2] sm:$0x3] %vm2307_vm13, %v2306_v26 }
 0xdc7   :  { %2818 = shalt.err (!%p2815_p4)
}
 0xdc8   :  { %s2819_s19 = scalar_lea.hbm %s3621_s15, 32 }
 0xdc9   :  { %p2820_p5 = scmp.ne.s32.totalorder %s3621_s15, %s2819_s19  ;;  %p2823_p6 = scmp.lt.u32.totalorder %s2819_s19, %s3621_s15 }
 0xdcb   :  { %p2825_p7 = pnand %p2823_p6, %p2820_p5 }
 0xdcd   :  { %2828 = shalt.err (!%p2825_p7)
}
 0xdce   :  { %2318 = dma.vmem_to_hbm [thread:$0]  %s2316_s14, 32, %s3621_s15, [#allocation3]  }
 0xdcf   :  { %2829 = dma.done.wait [#allocation3], 32  }
 0xdd0   :  { %2830 = vsyncadd [#allocation3], 4294967264 }
 0xdd1   :  { %2322 = vsyncpa [#allocation3], 1 }

</bundles_post_ra>
